<compile_context>
chip_gen: v7x
topology: tpu7x:2x2x1
jax: 0.10.0
libtpu: 0.0.40
codegen_flags: <defaults>
</compile_context>

<pallas_src>
import math

import jax
import jax.numpy as jnp
from jax.experimental import pallas as pl
from jax.experimental.pallas import tpu as pltpu


def _round_up(x: int, m: int) -> int:
    return ((x + m - 1) // m) * m


def _make_mlp_kernel(depth: int, out_d: int, narrow_output: bool,
                     matmul_dtype, act_dtype):
    """Kernel ref order: x, (w_i, b_i) for every layer, o.

    Weights are pre-transposed to (in, out) so y = x @ W + b matches nn.Linear.
    Biases are (1, features) f32 rows.  Accumulation is always f32.
    """
    n_layers = depth + 2

    def kernel(x_ref, *refs):
        o_ref = refs[-1]
        params = refs[:-1]

        h = x_ref[...].astype(matmul_dtype)
        for li in range(n_layers):                      # statically unrolled
            w = params[2 * li]
            b = params[2 * li + 1]
            pre = (jnp.dot(h, w[...], preferred_element_type=jnp.float32)
                   + b[...])
            if li < n_layers - 1:
                # tanh in act_dtype (f32 default; bf16 halves EUP work on
                # v6e/v7x), then a single cast back to the MXU operand dtype.
                h = jnp.tanh(pre.astype(act_dtype)).astype(matmul_dtype)
            else:
                if narrow_output:
                    # Narrow (masked) store: only the real out_d columns.
                    o_ref[...] = pre[:, :out_d].astype(o_ref.dtype)
                else:
                    # Lane-dense store of the full padded slab.
                    o_ref[...] = pre.astype(o_ref.dtype)

    return kernel


def mlp_forward(
    x,
    params,
    *,
    depth: int,
    tm: int | None = None,
    matmul_dtype=jnp.bfloat16,       # bf16 MXU operands by default (f32 acc)
    act_dtype=None,                  # None -> f32 tanh (safe on v5e)
    single_buffer_weights: bool = True,
    narrow_output: bool | None = None,
):
    """params: list of (W, b) with W shaped (in, out), b shaped (out,)."""
    n, d = x.shape
    hdim = params[0][0].shape[1]
    out_d = params[-1][0].shape[1]
    assert len(params) == depth + 2
    if act_dtype is None:
        act_dtype = jnp.float32

    LANE, SUB = 128, 8
    d_pad = _round_up(d, SUB)          # MXU K for layer 0 (zero-padded cols)
    h_pad = _round_up(hdim, LANE)      # lane-pad hidden width
    out_pad = _round_up(out_d, LANE)   # lane-dense output slab width

    # ---- batch tile -------------------------------------------------------
    # Split the batch into >= 2 parallel grid steps when possible so v7x's
    # two TensorCores both get work (costs ~0.35us extra elsewhere); cap 1024
    # keeps per-step VMEM tiny while minimizing step count on v5e/v6e.
    if tm is None:
        n8 = _round_up(n, SUB)
        tm = min(_round_up(pl.cdiv(n8, 2), SUB), 1024) if n8 >= 16 else n8
    tm = max(SUB, _round_up(tm, SUB))
    n_pad = _round_up(n, tm)

    x_p = jnp.zeros((n_pad, d_pad), jnp.float32).at[:n, :d].set(x)

    if narrow_output is None:
        # Lane-dense store unless the padded writeback would dominate HBM.
        narrow_output = (n_pad * out_pad * 4) > (32 << 20)
    out_cols = out_d if narrow_output else out_pad

    # ---- zero-pad parameters to aligned widths ----------------------------
    n_layers = len(params)
    flat_args = []
    for li, (w, b) in enumerate(params):
        fi, fo = w.shape
        fi_p = d_pad if li == 0 else h_pad
        fo_p = out_pad if li == n_layers - 1 else h_pad
        w_p = jnp.zeros((fi_p, fo_p), jnp.float32).at[:fi, :fo].set(w)
        b_p = jnp.zeros((1, fo_p), jnp.float32).at[0, :fo].set(b)
        flat_args += [w_p.astype(matmul_dtype), b_p]   # biases stay f32

    grid_steps = n_pad // tm

    # ---- specs ------------------------------------------------------------
    def build_specs(single_buffer: bool):
        def const_spec(shape):
            if single_buffer:
                # Grid-invariant blocks: no pipelining benefit, halve VMEM.
                return pl.BlockSpec(shape, lambda i: (0, 0),
                                    pipeline_mode=pl.Buffered(1))
            return pl.BlockSpec(shape, lambda i: (0, 0))

        in_specs = [pl.BlockSpec((tm, d_pad), lambda i: (i, 0))]
        for a in flat_args:
            in_specs.append(const_spec(a.shape))
        out_specs = pl.BlockSpec((tm, out_cols), lambda i: (i, 0))
        return in_specs, out_specs

    # ---- cost / VMEM hints -------------------------------------------------
    flops = 2 * n_pad * (d_pad * h_pad + depth * h_pad * h_pad
                         + h_pad * out_pad)
    transcendentals = n_pad * h_pad * (depth + 1)
    weight_bytes = sum(int(a.size) * a.dtype.itemsize for a in flat_args)
    bytes_accessed = (int(x_p.size) * x_p.dtype.itemsize
                      + n_pad * out_cols * 4
                      + weight_bytes)                 # weights fetched once
    # Per-step tiles are double-buffered; weights counted at worst-case 2x.
    vmem_need = (2 * weight_bytes
                 + 2 * tm * d_pad * 4 + 2 * tm * out_cols * 4
                 + 4 * tm * h_pad * 4)
    vmem_limit = int(min(max(2 * vmem_need, 32 << 20), 64 << 20))
    # TODO(synk): for very large hdim/depth (padded weights approaching v7x's
    # 64 MiB VMEM) tile the hidden dimension (grid over h_pad blocks or
    # pltpu.emit_pipeline over K) instead of keeping all weights resident.

    kernel = _make_mlp_kernel(depth, out_d, narrow_output,
                              matmul_dtype, act_dtype)

    def _call(single_buffer: bool):
        in_specs, out_specs = build_specs(single_buffer)
        return pl.pallas_call(
            kernel,
            out_shape=jax.ShapeDtypeStruct((n_pad, out_cols), jnp.float32),
            grid_spec=pltpu.PrefetchScalarGridSpec(
                num_scalar_prefetch=0,
                grid=(grid_steps,),
                in_specs=in_specs,
                out_specs=out_specs,
            ),
            compiler_params=pltpu.CompilerParams(
                dimension_semantics=("parallel",),
                vmem_limit_bytes=vmem_limit,
            ),
            cost_estimate=pl.CostEstimate(
                flops=flops,
                transcendentals=transcendentals,
                bytes_accessed=bytes_accessed,
            ),
        )(x_p, *flat_args)

    if single_buffer_weights:
        try:
            out_padded = _call(True)
        except Exception:
            # Fallback if this JAX build rejects Buffered(1) for these blocks.
            out_padded = _call(False)
    else:
        out_padded = _call(False)

    # Strip batch padding and (if lane-dense) the lane padding of the output.
    return out_padded[:n, :out_d]


def init_params(key, d, hdim, depth, out_d):
    """Deterministic PyTorch-style init: U(-1/sqrt(fan_in), 1/sqrt(fan_in))."""
    dims = [d] + [hdim] * (depth + 1) + [out_d]
    params = []
    for fan_in, fan_out in zip(dims[:-1], dims[1:]):
        key, kw, kb = jax.random.split(key, 3)
        bound = 1.0 / math.sqrt(fan_in)
        w = jax.random.uniform(kw, (fan_in, fan_out), jnp.float32, -bound, bound)
        b = jax.random.uniform(kb, (fan_out,), jnp.float32, -bound, bound)
        params.append((w, b))
    return params


def mlp_reference(x, params, depth):
    hp = jax.lax.Precision.HIGHEST
    h = jnp.tanh(jnp.dot(x, params[0][0], precision=hp) + params[0][1])
    for i in range(depth):
        h = jnp.tanh(jnp.dot(h, params[1 + i][0], precision=hp) + params[1 + i][1])
    return jnp.dot(h, params[-1][0], precision=hp) + params[-1][1]


if __name__ == "__main__":
    # Shapes consistent with the module defaults: d=2, hdim=200, depth=1, out_d=1.
    d, hdim, depth, out_d = 2, 200, 1, 1
    batch = 256

    key = jax.random.PRNGKey(0)
    key, kx = jax.random.split(key)
    x = jax.random.normal(kx, (batch, d), jnp.float32)
    params = init_params(key, d, hdim, depth, out_d)

    ref = mlp_reference(x, params, depth)

    # Default path: bf16 MXU operands, f32 accumulation, Buffered(1) weights.
    out = jax.block_until_ready(mlp_forward(x, params, depth=depth))
    assert out.shape == (batch, out_d)
    assert jnp.allclose(out, ref, atol=5e-2, rtol=5e-2), "bf16 mismatch vs reference"

    # Exact f32-operand path.
    out_f32 = jax.block_until_ready(
        mlp_forward(x, params, depth=depth, matmul_dtype=jnp.float32))
    assert jnp.allclose(out_f32, ref, atol=1e-4, rtol=1e-4), "f32 mismatch vs reference"

    # bf16 tanh path (halves EUP element count on v6e/v7x).
    out_bf16_act = jax.block_until_ready(
        mlp_forward(x, params, depth=depth, act_dtype=jnp.bfloat16))
    assert jnp.allclose(out_bf16_act, ref, atol=5e-2, rtol=5e-2), "bf16-tanh mismatch"

    # Narrow (out_d-wide) output store path for huge-batch HBM savings.
    out_narrow = jax.block_until_ready(
        mlp_forward(x, params, depth=depth, matmul_dtype=jnp.float32,
                    narrow_output=True))
    assert jnp.allclose(out_narrow, ref, atol=1e-4, rtol=1e-4), "narrow-output mismatch"

    # Non-tile-aligned batch exercises the wrapper-side padding path.
    out_odd = jax.block_until_ready(
        mlp_forward(x[:100], params, depth=depth, matmul_dtype=jnp.float32))
    assert jnp.allclose(out_odd, ref[:100], atol=1e-4, rtol=1e-4), "padded-batch mismatch"

    print("KERNEL_OK")
</pallas_src>

<mosaic_0001>
module attributes {stable_mosaic.version = 11 : i64} {
  func.func @kernel(%arg0: i32, %arg1: memref<128x8xf32, #tpu.memory_space<vmem>>, %arg2: memref<8x256xbf16, #tpu.memory_space<vmem>>, %arg3: memref<1x256xf32, #tpu.memory_space<vmem>>, %arg4: memref<256x256xbf16, #tpu.memory_space<vmem>>, %arg5: memref<1x256xf32, #tpu.memory_space<vmem>>, %arg6: memref<256x128xbf16, #tpu.memory_space<vmem>>, %arg7: memref<1x128xf32, #tpu.memory_space<vmem>>, %arg8: memref<128x128xf32, #tpu.memory_space<vmem>>) attributes {dimension_semantics = [#tpu.dimension_semantics<parallel>], iteration_bounds = array<i64: 2>, scalar_prefetch = 0 : i64, scratch_operands = 0 : i64, tpu.core_type = #tpu.core_type<tc>, window_params = [{transform_indices = @transform_0, window_bounds = array<i64: 128, 8>}, {pipeline_mode = #tpu.pipeline_mode<synchronous>, transform_indices = @transform_1, window_bounds = array<i64: 8, 256>}, {pipeline_mode = #tpu.pipeline_mode<synchronous>, transform_indices = @transform_2, window_bounds = array<i64: 1, 256>}, {pipeline_mode = #tpu.pipeline_mode<synchronous>, transform_indices = @transform_3, window_bounds = array<i64: 256, 256>}, {pipeline_mode = #tpu.pipeline_mode<synchronous>, transform_indices = @transform_4, window_bounds = array<i64: 1, 256>}, {pipeline_mode = #tpu.pipeline_mode<synchronous>, transform_indices = @transform_5, window_bounds = array<i64: 256, 128>}, {pipeline_mode = #tpu.pipeline_mode<synchronous>, transform_indices = @transform_6, window_bounds = array<i64: 1, 128>}, {transform_indices = @transform_7, window_bounds = array<i64: 128, 128>}]} {
    %c0 = arith.constant 0 : index
    %c0_0 = arith.constant 0 : index
    %0 = vector.load %arg1[%c0, %c0_0] : memref<128x8xf32, #tpu.memory_space<vmem>>, vector<128x8xf32>
    %1 = arith.truncf %0 : vector<128x8xf32> to vector<128x8xbf16>
    %c0_1 = arith.constant 0 : index
    %c0_2 = arith.constant 0 : index
    %2 = vector.load %arg2[%c0_1, %c0_2] : memref<8x256xbf16, #tpu.memory_space<vmem>>, vector<8x256xbf16>
    %cst = arith.constant dense<0.000000e+00> : vector<128x256xf32>
    %3 = tpu.matmul %1, %2, %cst {dimension_numbers = #tpu.dot_dimension_numbers<[1], [0], [0], [1], [0, 0, 1, 1], [], []>} : vector<128x8xbf16>, vector<8x256xbf16>, vector<128x256xf32> -> vector<128x256xf32>
    %c0_3 = arith.constant 0 : index
    %c0_4 = arith.constant 0 : index
    %4 = vector.load %arg3[%c0_3, %c0_4] : memref<1x256xf32, #tpu.memory_space<vmem>>, vector<1x256xf32>
    %5 = vector.broadcast %4 : vector<1x256xf32> to vector<128x256xf32>
    %6 = arith.addf %3, %5 : vector<128x256xf32>
    %7 = math.tanh %6 : vector<128x256xf32>
    %8 = arith.truncf %7 : vector<128x256xf32> to vector<128x256xbf16>
    %c0_5 = arith.constant 0 : index
    %c0_6 = arith.constant 0 : index
    %9 = vector.load %arg4[%c0_5, %c0_6] : memref<256x256xbf16, #tpu.memory_space<vmem>>, vector<256x256xbf16>
    %cst_7 = arith.constant dense<0.000000e+00> : vector<128x256xf32>
    %10 = tpu.matmul %8, %9, %cst_7 {dimension_numbers = #tpu.dot_dimension_numbers<[1], [0], [0], [1], [0, 0, 1, 1], [], []>} : vector<128x256xbf16>, vector<256x256xbf16>, vector<128x256xf32> -> vector<128x256xf32>
    %c0_8 = arith.constant 0 : index
    %c0_9 = arith.constant 0 : index
    %11 = vector.load %arg5[%c0_8, %c0_9] : memref<1x256xf32, #tpu.memory_space<vmem>>, vector<1x256xf32>
    %12 = vector.broadcast %11 : vector<1x256xf32> to vector<128x256xf32>
    %13 = arith.addf %10, %12 : vector<128x256xf32>
    %14 = math.tanh %13 : vector<128x256xf32>
    %15 = arith.truncf %14 : vector<128x256xf32> to vector<128x256xbf16>
    %c0_10 = arith.constant 0 : index
    %c0_11 = arith.constant 0 : index
    %16 = vector.load %arg6[%c0_10, %c0_11] : memref<256x128xbf16, #tpu.memory_space<vmem>>, vector<256x128xbf16>
    %cst_12 = arith.constant dense<0.000000e+00> : vector<128x128xf32>
    %17 = tpu.matmul %15, %16, %cst_12 {dimension_numbers = #tpu.dot_dimension_numbers<[1], [0], [0], [1], [0, 0, 1, 1], [], []>} : vector<128x256xbf16>, vector<256x128xbf16>, vector<128x128xf32> -> vector<128x128xf32>
    %c0_13 = arith.constant 0 : index
    %c0_14 = arith.constant 0 : index
    %18 = vector.load %arg7[%c0_13, %c0_14] : memref<1x128xf32, #tpu.memory_space<vmem>>, vector<1x128xf32>
    %19 = vector.broadcast %18 : vector<1x128xf32> to vector<128x128xf32>
    %20 = arith.addf %17, %19 : vector<128x128xf32>
    %c0_15 = arith.constant 0 : index
    %c0_16 = arith.constant 0 : index
    %21 = vector.load %arg8[%c0_15, %c0_16] : memref<128x128xf32, #tpu.memory_space<vmem>>, vector<128x128xf32>
    tpu.vector_store %arg8[%c0_15, %c0_16], %20 {strides = array<i32>} : memref<128x128xf32, #tpu.memory_space<vmem>>, vector<128x128xf32>,
    return
  }
  func.func @transform_0(%arg0: i32) -> (i32, i32) {
    %c0_i32 = arith.constant 0 : i32
    %c0_i32_0 = arith.constant 0 : i32
    return %arg0, %c0_i32 : i32, i32
  }
  func.func @transform_1(%arg0: i32) -> (i32, i32) {
    %c0_i32 = arith.constant 0 : i32
    %c0_i32_0 = arith.constant 0 : i32
    %c0_i32_1 = arith.constant 0 : i32
    return %c0_i32, %c0_i32_0 : i32, i32
  }
  func.func @transform_2(%arg0: i32) -> (i32, i32) {
    %c0_i32 = arith.constant 0 : i32
    %c0_i32_0 = arith.constant 0 : i32
    %c0_i32_1 = arith.constant 0 : i32
    return %c0_i32, %c0_i32_0 : i32, i32
  }
  func.func @transform_3(%arg0: i32) -> (i32, i32) {
    %c0_i32 = arith.constant 0 : i32
    %c0_i32_0 = arith.constant 0 : i32
    %c0_i32_1 = arith.constant 0 : i32
    return %c0_i32, %c0_i32_0 : i32, i32
  }
  func.func @transform_4(%arg0: i32) -> (i32, i32) {
    %c0_i32 = arith.constant 0 : i32
    %c0_i32_0 = arith.constant 0 : i32
    %c0_i32_1 = arith.constant 0 : i32
    return %c0_i32, %c0_i32_0 : i32, i32
  }
  func.func @transform_5(%arg0: i32) -> (i32, i32) {
    %c0_i32 = arith.constant 0 : i32
    %c0_i32_0 = arith.constant 0 : i32
    %c0_i32_1 = arith.constant 0 : i32
    return %c0_i32, %c0_i32_0 : i32, i32
  }
  func.func @transform_6(%arg0: i32) -> (i32, i32) {
    %c0_i32 = arith.constant 0 : i32
    %c0_i32_0 = arith.constant 0 : i32
    %c0_i32_1 = arith.constant 0 : i32
    return %c0_i32, %c0_i32_0 : i32, i32
  }
  func.func @transform_7(%arg0: i32) -> (i32, i32) {
    %c0_i32 = arith.constant 0 : i32
    %c0_i32_0 = arith.constant 0 : i32
    return %arg0, %c0_i32 : i32, i32
  }
}

module attributes {stable_mosaic.version = 11 : i64} {
  func.func @kernel(%arg0: i32, %arg1: memref<128x8xf32, #tpu.memory_space<vmem>>, %arg2: memref<8x256xbf16, #tpu.memory_space<vmem>>, %arg3: memref<1x256xf32, #tpu.memory_space<vmem>>, %arg4: memref<256x256xbf16, #tpu.memory_space<vmem>>, %arg5: memref<1x256xf32, #tpu.memory_space<vmem>>, %arg6: memref<256x128xbf16, #tpu.memory_space<vmem>>, %arg7: memref<1x128xf32, #tpu.memory_space<vmem>>, %arg8: memref<128x128xf32, #tpu.memory_space<vmem>>) attributes {dimension_semantics = [#tpu.dimension_semantics<parallel>], iteration_bounds = array<i64: 2>, scalar_prefetch = 0 : i64, scratch_operands = 0 : i64, tpu.core_type = #tpu.core_type<tc>, window_params = [{transform_indices = @transform_0, window_bounds = array<i64: 128, 8>}, {pipeline_mode = #tpu.pipeline_mode<synchronous>, transform_indices = @transform_1, window_bounds = array<i64: 8, 256>}, {pipeline_mode = #tpu.pipeline_mode<synchronous>, transform_indices = @transform_2, window_bounds = array<i64: 1, 256>}, {pipeline_mode = #tpu.pipeline_mode<synchronous>, transform_indices = @transform_3, window_bounds = array<i64: 256, 256>}, {pipeline_mode = #tpu.pipeline_mode<synchronous>, transform_indices = @transform_4, window_bounds = array<i64: 1, 256>}, {pipeline_mode = #tpu.pipeline_mode<synchronous>, transform_indices = @transform_5, window_bounds = array<i64: 256, 128>}, {pipeline_mode = #tpu.pipeline_mode<synchronous>, transform_indices = @transform_6, window_bounds = array<i64: 1, 128>}, {transform_indices = @transform_7, window_bounds = array<i64: 128, 128>}]} {
    %c0 = arith.constant 0 : index
    %c0_0 = arith.constant 0 : index
    %0 = vector.load %arg1[%c0, %c0_0] : memref<128x8xf32, #tpu.memory_space<vmem>>, vector<128x8xf32>
    %1 = arith.truncf %0 : vector<128x8xf32> to vector<128x8xbf16>
    %c0_1 = arith.constant 0 : index
    %c0_2 = arith.constant 0 : index
    %2 = vector.load %arg2[%c0_1, %c0_2] : memref<8x256xbf16, #tpu.memory_space<vmem>>, vector<8x256xbf16>
    %cst = arith.constant dense<0.000000e+00> : vector<128x256xf32>
    %3 = tpu.matmul %1, %2, %cst {dimension_numbers = #tpu.dot_dimension_numbers<[1], [0], [0], [1], [0, 0, 1, 1], [], []>} : vector<128x8xbf16>, vector<8x256xbf16>, vector<128x256xf32> -> vector<128x256xf32>
    %c0_3 = arith.constant 0 : index
    %c0_4 = arith.constant 0 : index
    %4 = vector.load %arg3[%c0_3, %c0_4] : memref<1x256xf32, #tpu.memory_space<vmem>>, vector<1x256xf32>
    %5 = vector.broadcast %4 : vector<1x256xf32> to vector<128x256xf32>
    %6 = arith.addf %3, %5 : vector<128x256xf32>
    %7 = math.tanh %6 : vector<128x256xf32>
    %8 = arith.truncf %7 : vector<128x256xf32> to vector<128x256xbf16>
    %c0_5 = arith.constant 0 : index
    %c0_6 = arith.constant 0 : index
    %9 = vector.load %arg4[%c0_5, %c0_6] : memref<256x256xbf16, #tpu.memory_space<vmem>>, vector<256x256xbf16>
    %cst_7 = arith.constant dense<0.000000e+00> : vector<128x256xf32>
    %10 = tpu.matmul %8, %9, %cst_7 {dimension_numbers = #tpu.dot_dimension_numbers<[1], [0], [0], [1], [0, 0, 1, 1], [], []>} : vector<128x256xbf16>, vector<256x256xbf16>, vector<128x256xf32> -> vector<128x256xf32>
    %c0_8 = arith.constant 0 : index
    %c0_9 = arith.constant 0 : index
    %11 = vector.load %arg5[%c0_8, %c0_9] : memref<1x256xf32, #tpu.memory_space<vmem>>, vector<1x256xf32>
    %12 = vector.broadcast %11 : vector<1x256xf32> to vector<128x256xf32>
    %13 = arith.addf %10, %12 : vector<128x256xf32>
    %14 = math.tanh %13 : vector<128x256xf32>
    %15 = arith.truncf %14 : vector<128x256xf32> to vector<128x256xbf16>
    %c0_10 = arith.constant 0 : index
    %c0_11 = arith.constant 0 : index
    %16 = vector.load %arg6[%c0_10, %c0_11] : memref<256x128xbf16, #tpu.memory_space<vmem>>, vector<256x128xbf16>
    %cst_12 = arith.constant dense<0.000000e+00> : vector<128x128xf32>
    %17 = tpu.matmul %15, %16, %cst_12 {dimension_numbers = #tpu.dot_dimension_numbers<[1], [0], [0], [1], [0, 0, 1, 1], [], []>} : vector<128x256xbf16>, vector<256x128xbf16>, vector<128x128xf32> -> vector<128x128xf32>
    %c0_13 = arith.constant 0 : index
    %c0_14 = arith.constant 0 : index
    %18 = vector.load %arg7[%c0_13, %c0_14] : memref<1x128xf32, #tpu.memory_space<vmem>>, vector<1x128xf32>
    %19 = vector.broadcast %18 : vector<1x128xf32> to vector<128x128xf32>
    %20 = arith.addf %17, %19 : vector<128x128xf32>
    %c0_15 = arith.constant 0 : index
    %c0_16 = arith.constant 0 : index
    %21 = vector.load %arg8[%c0_15, %c0_16] : memref<128x128xf32, #tpu.memory_space<vmem>>, vector<128x128xf32>
    tpu.vector_store %arg8[%c0_15, %c0_16], %20 {strides = array<i32>} : memref<128x128xf32, #tpu.memory_space<vmem>>, vector<128x128xf32>,
    return
  }
  func.func @transform_0(%arg0: i32) -> (i32, i32) {
    %c0_i32 = arith.constant 0 : i32
    %c0_i32_0 = arith.constant 0 : i32
    return %arg0, %c0_i32 : i32, i32
  }
  func.func @transform_1(%arg0: i32) -> (i32, i32) {
    %c0_i32 = arith.constant 0 : i32
    %c0_i32_0 = arith.constant 0 : i32
    %c0_i32_1 = arith.constant 0 : i32
    return %c0_i32, %c0_i32_0 : i32, i32
  }
  func.func @transform_2(%arg0: i32) -> (i32, i32) {
    %c0_i32 = arith.constant 0 : i32
    %c0_i32_0 = arith.constant 0 : i32
    %c0_i32_1 = arith.constant 0 : i32
    return %c0_i32, %c0_i32_0 : i32, i32
  }
  func.func @transform_3(%arg0: i32) -> (i32, i32) {
    %c0_i32 = arith.constant 0 : i32
    %c0_i32_0 = arith.constant 0 : i32
    %c0_i32_1 = arith.constant 0 : i32
    return %c0_i32, %c0_i32_0 : i32, i32
  }
  func.func @transform_4(%arg0: i32) -> (i32, i32) {
    %c0_i32 = arith.constant 0 : i32
    %c0_i32_0 = arith.constant 0 : i32
    %c0_i32_1 = arith.constant 0 : i32
    return %c0_i32, %c0_i32_0 : i32, i32
  }
  func.func @transform_5(%arg0: i32) -> (i32, i32) {
    %c0_i32 = arith.constant 0 : i32
    %c0_i32_0 = arith.constant 0 : i32
    %c0_i32_1 = arith.constant 0 : i32
    return %c0_i32, %c0_i32_0 : i32, i32
  }
  func.func @transform_6(%arg0: i32) -> (i32, i32) {
    %c0_i32 = arith.constant 0 : i32
    %c0_i32_0 = arith.constant 0 : i32
    %c0_i32_1 = arith.constant 0 : i32
    return %c0_i32, %c0_i32_0 : i32, i32
  }
  func.func @transform_7(%arg0: i32) -> (i32, i32) {
    %c0_i32 = arith.constant 0 : i32
    %c0_i32_0 = arith.constant 0 : i32
    return %arg0, %c0_i32 : i32, i32
  }
}

</mosaic_0001>

<bundles_post_ra>
// kernel: tpu_custom_call.1
= control target key start
LH: loop header
LB: loop body
LE: loop exit
PB: predicated region body
PF: predicated region fallthrough
CT: control target
= control target key end

     0   :  { %12 = vsyncpa [#allocation3], 0  ;;  %s2167_s0 = inlined_call_operand.vmem [shape: f32[256,8], index: 0, kind: input, shape index: {}]   ;;  %s2168_s1 = inlined_call_operand.vmem [shape: bf16[8,256], index: 1, kind: input, shape index: {}]   ;;  %s2169_s2 = inlined_call_operand.vmem [shape: f32[1,256], index: 2, kind: input, shape index: {}]   ;;  %s2170_s3 = inlined_call_operand.vmem [shape: bf16[256,256], index: 3, kind: input, shape index: {}]   ;;  %s2171_s4 = inlined_call_operand.vmem [shape: f32[1,256], index: 4, kind: input, shape index: {}]   ;;  %s2172_s5 = inlined_call_operand.hbm [shape: bf16[256,128], index: 5, kind: input, shape index: {}]   ;;  %s2173_s6 = inlined_call_operand.vmem [shape: f32[1,128], index: 6, kind: input, shape index: {}]   ;;  %s2174_s7 = inlined_call_operand.hbm [shape: f32[256,128], index: 7, kind: output, shape index: {}]  }
   0x1   :  { %13 = vsyncpa [#allocation4], 0 }
   0x2   :  { %15 = vsyncpa [#allocation4 + $0x1], 0  ;;  %s1763_s24 = smov 0   ;;  %s1765_s25 = smov 0  }
   0x3   :  { %s1767_s26 = smov 0   ;;  %s1769_s27 = smov 0  }
   0x4 LB: > { %s1784_s28 = sadd.s32 4294967295, %s1714_s27   ;;  %s1232_s29 = sadd.s32 4294967294, %s1714_s27   ;;  %s1714_s27 = sphi %s1769_s27, %s2190_s27   ;;  %s1710_s26 = sphi %s1767_s26, %s2189_s26   ;;  %s1706_s25 = sphi %s1765_s25, %s2188_s25   ;;  %s1702_s24 = sphi %s1763_s24, %s2187_s24  }
   0x5   : > { %s1788_s30 = sadd.s32 1, %s1714_s27   ;;  %s180_s8 = sadd.s32 1, %s1710_s26 }
   0x6   : > { %s177_s9 = ssub.s32 %s1714_s27, %s1788_s30  ;;  %p190_p0 = scmp.ne.s32.totalorder %s1710_s26, %s1706_s25 }
   0x7   : > { %p178_p1 = scmp.eq.s32.totalorder %s177_s9, 0  ;;  %p191_p2 = scmp.eq.s32.totalorder %s1784_s28, 1 }
   0x8   : > { %p196_p3 = scmp.ne.s32.totalorder %s1706_s25, %s1702_s24  ;;  %p197_p4 = scmp.eq.s32.totalorder %s1232_s29, 1 }
   0x9   : > { %s1799_s10 = scalar_select %p178_p1, %s1710_s26, %s180_s8  }
   0xa   : > { %p1801_p5 = por %p191_p2, %p190_p0  ;;  %p1805_p6 = por %p197_p4, %p196_p3 }
   0xb   : > { %p1233_p7 = scmp.ge.s32.totalorder %s1714_s27, 1  ;;  %p204_p8 = scmp.lt.s32.totalorder %s1714_s27, 3 }
   0xc   : > { %s2178_s11 = scalar_select %p1801_p5, 1, 0 }
   0xd   : > { %s2179_s12 = scalar_select %p1805_p6, 1, 0 }
   0xe   : > { %p2175_p9 = scmp.eq.s32.totalorder %s1784_s28, 0  ;;  %p1812_p10 = pnand %p1233_p7, %p204_p8 }
   0xf   : > { %s1716_s14 = smov [#allocation2]   ;;  %s1620_s19 = scalar_lea.hbm %s2172_s5, 2048 }
  0x10   : > { %s2180_s13 = scalar_select %p1812_p10, 1, 0 }
  0x11   : > { %s228_s15 = sshll.u32 %s1716_s14, 4  ;;  %p1377_p11 = pneg %p1812_p10  ;;  %s229_s15 = int_to_ptr.vmem [resolvable:$true] %s228_s15 }
  0x12   : > { %p1621_p13 = scmp.ne.s32.totalorder %s2172_s5, %s1620_s19  ;;  %p1627_p3 = scmp.lt.u32.totalorder %s1620_s19, %s2172_s5 }
  0x13   : > { %p1820_p12 = pnand %p2175_p9, %p1377_p11 }
  0x15   : > { %p1622_p0 = pneg %p1820_p12 }
  0x17   : > { %p1623_p1 = pnand %p1622_p0, %p1621_p13 }
  0x19   : > { %p1624_p2 = pneg %p1623_p1 }
  0x1b   : > { %p1629_p4 = pnand %p1627_p3, %p1624_p2 }
  0x1d   : > { %1632 = shalt.err (!%p1629_p4)
}
  0x1e   : > { %s1633_s29 = scalar_lea.vmem %s229_s15, 2048  ;;  %p1641_p9 = scmp.lt.s32.totalorder %s229_s15, %s229_s15 }
  0x1f   : > { %p1634_p7 = scmp.ne.s32.totalorder %s229_s15, %s1633_s29  ;;  %p1642_p6 = scmp.lt.s32.totalorder %s1633_s29, %s1633_s29 }
  0x21   : > { %p1636_p8 = pnand %p1634_p7, %p1622_p0  ;;  %p1643_p5 = por %p1642_p6, %p1641_p9 }
  0x23   : > { %p1637_p11 = pneg %p1636_p8 }
  0x25   : > { %p1644_p10 = pnand %p1643_p5, %p1637_p11 }
  0x27   : > { %1647 = shalt.err (!%p1644_p10)
}
  0x28   : > { %s1717_s8 = smov 64   ;;  %s1718_s9 = smov 4  }
  0x29   : > { %1380 = dma.hbm_to_vmem [thread:$0]  (!%p1820_p12), %s2172_s5, 2048, %s229_s15, [#allocation3], %s1717_s8, %s1717_s8, %s1718_s9  }
  0x2a   : > { %p2182_p13 = scmp.ne.s32.totalorder %s2180_s13, 0 }
  0x2b   : > { %p2183_p1 = scmp.eq.s32.totalorder (!%p2182_p13), %s1784_s28, 0 }
  0x2c   : > { %256 = sbr.rel (%p2182_p13) target bundleno = 813 (0x32d), region = 48 }
  0x33   : > { %1693 = dma.done.wait (%p2183_p1), [#allocation3], 2048   ;;  %p2184_p0 = pmov %p2183_p1 }
  0x34   : > { %s1239_s18 = sshll.u32 %s1784_s28, 4  ;;  %v1719_v0 = vmov 0   ;;  %v320_v1 = vld [vmem:[%s2168_s1] sm:$0xff]  ;;  %vm363_vm0 = vcmask 1043456   ;;  %vm338_vm1 = vcmask 64512   ;;  %v1478_v63 = vld [vmem:[#allocation2 + $0x48] sm:$0xff]  }
  0x35   : > { %1695 = vsyncadd (%p2184_p0), [#allocation3], 4294965248  ;;  %402 = vmatprep.mubr.bf16.mxu0 %v1719_v0  ;;  %p289_p5 = scmp.lt.s32.totalorder %s1239_s18, 31  ;;  %v1242_v4 = vcombine.high %v320_v1, %v320_v1  ;;  %v1241_v5 = vcombine.low %v320_v1, %v320_v1  ;;  %v1428_v9 = vld [vmem:[%s2170_s3 + $0x4] ss:$8 sps:$4 sm:$0xff]   ;;  %v1480_v1 = vld [vmem:[#allocation2 + $0x50] sm:$0xff]  }
  0x36   : > { %v1430_v10 = vld [vmem:[%s2170_s3] ss:$8 sps:$4 sm:$0xff]   ;;  %v1431_v11 = vld [vmem:[%s2170_s3 + $0x14] ss:$8 sps:$4 sm:$0xff]   ;;  %735 = vmatprep.subr.bf16.mxu1 %v1428_v9  ;;  %v1433_v13 = vld [vmem:[%s2170_s3 + $0x10] ss:$8 sps:$4 sm:$0xff]   ;;  %v323_v9 = vlaneseq }
  0x37   : > { %s2192_s18 = smov (!%p289_p5, %s1239_s18), 31  ;;  %1243 = vmatprep.subr.msk.bf16.mxu0 %vm363_vm0, %v1242_v4  ;;  %v365_v6 = vsel %vm363_vm0, %v1241_v5, 0  ;;  %736 = vmatpush1.bf16.msra.mxu1 %v1430_v10  ;;  %v1434_v14 = vld [vmem:[%s2170_s3 + $0x24] ss:$8 sps:$4 sm:$0xff]   ;;  %v1436_v16 = vld [vmem:[%s2170_s3 + $0x20] ss:$8 sps:$4 sm:$0xff]  }
  0x38   : > { %s1240_s16 = sshll.u32 %s2192_s18, 3  ;;  %371 = vmatpush1.bf16.msra.mxu0 %v365_v6  ;;  %737 = vmatprep.subr.bf16.mxu1 %v1431_v11  ;;  %v1437_v17 = vld [vmem:[%s2170_s3 + $0x34] ss:$8 sps:$4 sm:$0xff]   ;;  %v1439_v20 = vld [vmem:[%s2170_s3 + $0x30] ss:$8 sps:$4 sm:$0xff]   ;;  %v1476_v61 = vld [vmem:[#allocation2 + $0x40] sm:$0xff]  }
  0x39   : > { %s1851_s15 = scalar_lea.vmem %s2167_s0, %s1240_s16  ;;  %v1440_v21 = vld [vmem:[%s2170_s3 + $0x44] ss:$8 sps:$4 sm:$0xff]   ;;  %v1442_v23 = vld [vmem:[%s2170_s3 + $0x40] ss:$8 sps:$4 sm:$0xff]   ;;  %v1443_v24 = vld [vmem:[%s2170_s3 + $0x54] ss:$8 sps:$4 sm:$0xff]   ;;  %1307 = vmatprep.subr.bf16.mxu0 %v1476_v61 }
  0x3a   : > { %v296_v2 = vld [vmem:[%s1851_s15] sm:$0xff]  ;;  %v297_v3 = vld [vmem:[%s1851_s15 + $0x8] sm:$0xff]  ;;  %v298_v8 = vld [vmem:[%s1851_s15 + $0x10] sm:$0xff]  ;;  %v1983_v10 = vshrl.u32 %v323_v9, 7  ;;  %s285_s23 = sand.u32 1, %s1706_s25   ;;  %s1306_s17 = sshll.u32 %s1784_s28, 11 }
  0x3b   : > { %v312_v7 = vpack.c.bf16 %v297_v3, %v296_v2  ;;  %v299_v12 = vld [vmem:[%s1851_s15 + $0x18] sm:$0xff]  ;;  %738 = vmatpush1.bf16.msra.mxu1 %v1433_v13  ;;  %v300_v18 = vld [vmem:[%s1851_s15 + $0x20] sm:$0xff]  ;;  %v301_v19 = vld [vmem:[%s1851_s15 + $0x28] sm:$0xff]  ;;  %s1238_s29 = sshll.u32 %s285_s23, 7  ;;  %s2117_s20 = scalar_lea.hbm %s2174_s7, %s1306_s17 }
  0x3c   : > { %v313_v15 = vpack.c.bf16 %v299_v12, %v298_v8  ;;  %739 = vmatprep.subr.bf16.mxu1 %v1434_v14  ;;  %v314_v22 = vpack.c.bf16 %v301_v19, %v300_v18  ;;  %v302_v25 = vld [vmem:[%s1851_s15 + $0x30] sm:$0xff]  ;;  %v303_v26 = vld [vmem:[%s1851_s15 + $0x38] sm:$0xff]  ;;  %v1446_v28 = vld [vmem:[%s2170_s3 + $0x64] ss:$8 sps:$4 sm:$0xff]   ;;  %v325_v11 = vsub.s32 0, %v1983_v10  ;;  %v329_v13 = vsub.s32 1, %v1983_v10 }
  0x3d   : > { %1244 = vmatmul.mubr.msk.bf16.vlgmr.msra.gmra.mrb[0].mxu0 %vm338_vm1, %v312_v7  ;;  %v1445_v27 = vld [vmem:[%s2170_s3 + $0x50] ss:$8 sps:$4 sm:$0xff]   ;;  %v315_v29 = vpack.c.bf16 %v303_v26, %v302_v25  ;;  %v1448_v30 = vld [vmem:[%s2170_s3 + $0x60] ss:$8 sps:$4 sm:$0xff]   ;;  %v1449_v31 = vld [vmem:[%s2170_s3 + $0x74] ss:$8 sps:$4 sm:$0xff]  }
  0x3e   : > { %412 = vmatprep.mubr.bf16.mxu0 %v1719_v0  ;;  %v304_v32 = vld [vmem:[%s1851_s15 + $0x40] sm:$0xff]  ;;  %v305_v33 = vld [vmem:[%s1851_s15 + $0x48] sm:$0xff]  ;;  %v1451_v34 = vld [vmem:[%s2170_s3 + $0x70] ss:$8 sps:$4 sm:$0xff]   ;;  %s2082_s14 = scalar_lea.vmem [#allocation5], %s1238_s29  ;;  %s2126_s28 = scalar_lea.sflag [#allocation4], %s285_s23 }
  0x3f   : > { %740 = vmatpush1.bf16.msra.mxu1 %v1436_v16  ;;  %v1452_v35 = vld [vmem:[%s2170_s3 + $0x84] ss:$8 sps:$4 sm:$0xff]   ;;  %v316_v36 = vpack.c.bf16 %v305_v33, %v304_v32  ;;  %v1454_v37 = vld [vmem:[%s2170_s3 + $0x80] ss:$8 sps:$4 sm:$0xff]   ;;  %v1455_v38 = vld [vmem:[%s2170_s3 + $0x94] ss:$8 sps:$4 sm:$0xff]  }
  0x40   : > { %741 = vmatprep.subr.bf16.mxu1 %v1437_v17  ;;  %v306_v39 = vld [vmem:[%s1851_s15 + $0x50] sm:$0xff]  ;;  %v307_v40 = vld [vmem:[%s1851_s15 + $0x58] sm:$0xff]  ;;  %v1458_v42 = vld [vmem:[%s2170_s3 + $0xa4] ss:$8 sps:$4 sm:$0xff]   ;;  %s1158_s18 = sshll.u32 %s2082_s14, 4  ;;  %p2185_p9 = scmp.ne.s32.totalorder %s2178_s11, 0  ;;  %s2119_s18 = int_to_ptr.vmem [resolvable:$true] %s1158_s18 }
  0x41   : > { %v1457_v41 = vld [vmem:[%s2170_s3 + $0x90] ss:$8 sps:$4 sm:$0xff]   ;;  %v317_v43 = vpack.c.bf16 %v307_v40, %v306_v39  ;;  %v1460_v44 = vld [vmem:[%s2170_s3 + $0xa0] ss:$8 sps:$4 sm:$0xff]   ;;  %v1461_v51 = vld [vmem:[%s2170_s3 + $0xb4] ss:$8 sps:$4 sm:$0xff]  }
  0x42   : > { %v308_v45 = vld [vmem:[%s1851_s15 + $0x60] sm:$0xff]  ;;  %v309_v46 = vld [vmem:[%s1851_s15 + $0x68] sm:$0xff]  ;;  %v310_v48 = vld [vmem:[%s1851_s15 + $0x70] sm:$0xff]  ;;  %s1648_s13 = scalar_lea.vmem %s2119_s18, 2048  ;;  %s1720_s21 = smov [#allocation5]  }
  0x43   : > { %742 = vmatpush1.bf16.msra.mxu1 %v1439_v20  ;;  %v318_v47 = vpack.c.bf16 %v309_v46, %v308_v45  ;;  %v311_v49 = vld [vmem:[%s1851_s15 + $0x78] sm:$0xff]  ;;  %v1464_v53 = vld [vmem:[%s2170_s3 + $0xc4] ss:$8 sps:$4 sm:$0xff]   ;;  %v1466_v54 = vld [vmem:[%s2170_s3 + $0xc0] ss:$8 sps:$4 sm:$0xff]   ;;  %p1649_p6 = scmp.ne.s32.totalorder %s2119_s18, %s1648_s13  ;;  %s1652_s15 = sshll.u32 %s1720_s21, 4  ;;  %s1653_s15 = int_to_ptr.vmem [resolvable:$false] %s1652_s15 }
  0x44   : > { %743 = vmatprep.subr.bf16.mxu1 %v1440_v21  ;;  %v319_v50 = vpack.c.bf16 %v311_v49, %v310_v48  ;;  %v1463_v52 = vld [vmem:[%s2170_s3 + $0xb0] ss:$8 sps:$4 sm:$0xff]   ;;  %v1467_v55 = vld [vmem:[%s2170_s3 + $0xd4] ss:$8 sps:$4 sm:$0xff]   ;;  %v1470_v57 = vld [vmem:[%s2170_s3 + $0xe4] ss:$8 sps:$4 sm:$0xff]   ;;  %p1655_p2 = scmp.lt.s32.totalorder %s2119_s18, %s1653_s15 }
  0x45   : > { %1245 = vmatmul.mubr.msk.bf16.gmra.mrb[4].mxu0 %vm338_vm1, %v313_v15  ;;  %v1469_v56 = vld [vmem:[%s2170_s3 + $0xd0] ss:$8 sps:$4 sm:$0xff]   ;;  %v1472_v58 = vld [vmem:[%s2170_s3 + $0xe0] ss:$8 sps:$4 sm:$0xff]   ;;  %v1473_v59 = vld [vmem:[%s2170_s3 + $0xf4] ss:$8 sps:$4 sm:$0xff]   ;;  %p1650_p10 = pnand %p1649_p6, %p2185_p9 }
  0x46   : > { %422 = vmatprep.mubr.bf16.mxu0 %v1719_v0  ;;  %v1475_v60 = vld [vmem:[%s2170_s3 + $0xf0] ss:$8 sps:$4 sm:$0xff]   ;;  %v1477_v62 = vld [vmem:[#allocation2] sm:$0xff]   ;;  %v1486_v7 = vld [vmem:[#allocation2 + $0x68] sm:$0xff]   ;;  %s1654_s22 = scalar_lea.vmem %s1653_s15, 4096 }
  0x47   : > { %744 = vmatpush1.bf16.msra.mxu1 %v1442_v23  ;;  %1308 = vmatpush3.bf16.msra.mxu0 %v1477_v62  ;;  %v1481_v2 = vld [vmem:[#allocation2 + $0x10] sm:$0xff]   ;;  %v1482_v3 = vld [vmem:[#allocation2 + $0x58] sm:$0xff]   ;;  %v1484_v5 = vld [vmem:[#allocation2 + $0x60] sm:$0xff]   ;;  %p1651_p12 = pneg %p1650_p10  ;;  %p1656_p3 = scmp.lt.s32.totalorder %s1654_s22, %s1648_s13 }
  0x48   : > { %745 = vmatprep.subr.bf16.mxu1 %v1443_v24  ;;  %1309 = vmatprep.subr.bf16.mxu0 %v1478_v63  ;;  %v1483_v4 = vld [vmem:[#allocation2 + $0x18] sm:$0xff]   ;;  %v1485_v6 = vld [vmem:[#allocation2 + $0x20] sm:$0xff]   ;;  %v1487_v8 = vld [vmem:[#allocation2 + $0x28] sm:$0xff]  }
  0x49   : > { %v321_v12 = vld [vmem:[%s2169_s2] sm:$0x3]  ;;  %p1657_p4 = por %p1656_p3, %p1655_p2 }
  0x4a   : > { %v1992_v14 = vrot.slane %v321_v12, %v325_v11  ;;  %v1996_v15 = vrot.slane %v321_v12, %v329_v13 }
  0x4b   : > { %746 = vmatpush1.bf16.msra.mxu1 %v1445_v27  ;;  %p1658_p7 = pnand %p1657_p4, %p1651_p12 }
  0x4c   : > { %747 = vmatprep.subr.bf16.mxu1 %v1446_v28 }
  0x4d   : > { %1246 = vmatmul.mubr.msk.bf16.gmra.mrb[8].mxu0 %vm338_vm1, %v314_v22 }
  0x4e   : > { %432 = vmatprep.mubr.bf16.mxu0 %v1719_v0 }
  0x4f   : > { %748 = vmatpush1.bf16.msra.mxu1 %v1448_v30 }
  0x50   : > { %749 = vmatprep.subr.bf16.mxu1 %v1449_v31 }
  0x53   : > { %750 = vmatpush1.bf16.msra.mxu1 %v1451_v34 }
  0x54   : > { %751 = vmatprep.subr.bf16.mxu1 %v1452_v35 }
  0x55   : > { %1247 = vmatmul.mubr.msk.bf16.gmra.mrb[12].mxu0 %vm338_vm1, %v315_v29 }
  0x56   : > { %442 = vmatprep.mubr.bf16.mxu0 %v1719_v0 }
  0x57   : > { %752 = vmatpush1.bf16.msra.mxu1 %v1454_v37 }
  0x58   : > { %753 = vmatprep.subr.bf16.mxu1 %v1455_v38 }
  0x5b   : > { %754 = vmatpush1.bf16.msra.mxu1 %v1457_v41 }
  0x5c   : > { %755 = vmatprep.subr.bf16.mxu1 %v1458_v42 }
  0x5d   : > { %1248 = vmatmul.mubr.msk.bf16.gmra.mrb[16].mxu0 %vm338_vm1, %v316_v36 }
  0x5e   : > { %452 = vmatprep.mubr.bf16.mxu0 %v1719_v0 }
  0x5f   : > { %756 = vmatpush1.bf16.msra.mxu1 %v1460_v44 }
  0x60   : > { %757 = vmatprep.subr.bf16.mxu1 %v1461_v51 }
  0x63   : > { %758 = vmatpush1.bf16.msra.mxu1 %v1463_v52 }
  0x64   : > { %759 = vmatprep.subr.bf16.mxu1 %v1464_v53 }
  0x65   : > { %1249 = vmatmul.mubr.msk.bf16.gmra.mrb[20].mxu0 %vm338_vm1, %v317_v43 }
  0x66   : > { %462 = vmatprep.mubr.bf16.mxu0 %v1719_v0 }
  0x67   : > { %760 = vmatpush1.bf16.msra.mxu1 %v1466_v54 }
  0x68   : > { %761 = vmatprep.subr.bf16.mxu1 %v1467_v55 }
  0x6b   : > { %762 = vmatpush1.bf16.msra.mxu1 %v1469_v56 }
  0x6c   : > { %763 = vmatprep.subr.bf16.mxu1 %v1470_v57 }
  0x6d   : > { %1250 = vmatmul.mubr.msk.bf16.gmra.mrb[24].mxu0 %vm338_vm1, %v318_v47 }
  0x6e   : > { %472 = vmatprep.mubr.bf16.mxu0 %v1719_v0  ;;  %v1479_v0 = vld [vmem:[#allocation2 + $0x8] sm:$0xff]  }
  0x6f   : > { %764 = vmatpush1.bf16.msra.mxu1 %v1472_v58  ;;  %1310 = vmatpush3.bf16.msra.mxu0 %v1479_v0 }
  0x70   : > { %765 = vmatprep.subr.bf16.mxu1 %v1473_v59  ;;  %1311 = vmatprep.subr.bf16.mxu0 %v1480_v1 }
  0x73   : > { %766 = vmatpush1.bf16.msra.mxu1 %v1475_v60  ;;  %1312 = vmatpush3.bf16.msra.mxu0 %v1481_v2 }
  0x74   : > { %1313 = vmatprep.subr.bf16.mxu0 %v1482_v3 }
  0x75   : > { %1251 = vmatmul.mubr.msk.bf16.gmra.mrb[28].mxu0 %vm338_vm1, %v319_v50 }
  0x77   : > { %1314 = vmatpush3.bf16.msra.mxu0 %v1483_v4 }
  0x78   : > { %1315 = vmatprep.subr.bf16.mxu0 %v1484_v5 }
  0x7b   : > { %1316 = vmatpush3.bf16.msra.mxu0 %v1485_v6 }
  0x7c   : > { %1317 = vmatprep.subr.bf16.mxu0 %v1486_v7 }
  0x7f   : > { %1318 = vmatpush3.bf16.msra.mxu0 %v1487_v8 }
 0x110   : > { %v404_v16 = vpop.f32.mrb[0].mxu0 }
 0x111   : > { %v405_v17 = vadd.f32 %v404_v16, %v1992_v14  ;;  %v406_v18 = vpop.f32.mrb[1].mxu0 }
 0x112   : > { %v407_v19 = vadd.f32 %v406_v18, %v1996_v15  ;;  %v408_v20 = vpop.f32.mrb[2].mxu0 }
 0x113   : > { %1492 = vtanh.f32 %v405_v17  ;;  %v409_v21 = vadd.f32 %v408_v20, %v1992_v14  ;;  %v410_v22 = vpop.f32.mrb[3].mxu0 }
 0x114   : > { %1494 = vtanh.f32 %v407_v19  ;;  %v411_v23 = vadd.f32 %v410_v22, %v1996_v15 }
 0x115   : > { %1496 = vtanh.f32 %v409_v21 }
 0x116   : > { %1498 = vtanh.f32 %v411_v23 }
 0x118   : > { %v414_v24 = vpop.f32.mrb[4].mxu0 }
 0x119   : > { %v415_v25 = vadd.f32 %v414_v24, %v1992_v14  ;;  %v416_v26 = vpop.f32.mrb[5].mxu0 }
 0x11a   : > { %v417_v27 = vadd.f32 %v416_v26, %v1996_v15  ;;  %v418_v28 = vpop.f32.mrb[6].mxu0 }
 0x11b   : > { %1500 = vtanh.f32 %v415_v25  ;;  %v419_v29 = vadd.f32 %v418_v28, %v1992_v14  ;;  %v420_v30 = vpop.f32.mrb[7].mxu0 }
 0x11c   : > { %1502 = vtanh.f32 %v417_v27  ;;  %v421_v31 = vadd.f32 %v420_v30, %v1996_v15 }
 0x11d   : > { %v1493_v32 = vpop.eup %1492  ;;  %1504 = vtanh.f32 %v419_v29 }
 0x11e   : > { %v1495_v33 = vpop.eup %1494  ;;  %1506 = vtanh.f32 %v421_v31 }
 0x11f   : > { %v1497_v34 = vpop.eup %1496 }
 0x120   : > { %v1499_v35 = vpop.eup %1498  ;;  %v424_v36 = vpop.f32.mrb[8].mxu0  ;;  %v515_v37 = vpack.c.bf16 %v1497_v34, %v1493_v32 }
 0x121   : > { %v425_v38 = vadd.f32 %v424_v36, %v1992_v14  ;;  %v426_v39 = vpop.f32.mrb[9].mxu0  ;;  %v516_v40 = vpack.c.bf16 %v1499_v35, %v1495_v33 }
 0x122   : > { %v427_v41 = vadd.f32 %v426_v39, %v1996_v15  ;;  %v428_v42 = vpop.f32.mrb[10].mxu0 }
 0x123   : > { %1508 = vtanh.f32 %v425_v38  ;;  %v429_v43 = vadd.f32 %v428_v42, %v1992_v14  ;;  %v430_v44 = vpop.f32.mrb[11].mxu0  ;;  %767 = vmatprep.mubr.bf16.mxu1 %v516_v40 }
 0x124   : > { %1510 = vtanh.f32 %v427_v41  ;;  %v431_v45 = vadd.f32 %v430_v44, %v1996_v15  ;;  %768 = vmatmul.mubr.bf16.vlgmr.msra.gmra.mrb[0].mxu1 %v515_v37 }
 0x125   : > { %v1501_v46 = vpop.eup %1500  ;;  %1512 = vtanh.f32 %v429_v43 }
 0x126   : > { %v1503_v47 = vpop.eup %1502  ;;  %1514 = vtanh.f32 %v431_v45 }
 0x127   : > { %v1505_v48 = vpop.eup %1504 }
 0x128   : > { %v1507_v49 = vpop.eup %1506  ;;  %v434_v50 = vpop.f32.mrb[12].mxu0  ;;  %v517_v51 = vpack.c.bf16 %v1505_v48, %v1501_v46 }
 0x129   : > { %v435_v52 = vadd.f32 %v434_v50, %v1992_v14  ;;  %v436_v53 = vpop.f32.mrb[13].mxu0  ;;  %v518_v54 = vpack.c.bf16 %v1507_v49, %v1503_v47 }
 0x12a   : > { %v437_v55 = vadd.f32 %v436_v53, %v1996_v15  ;;  %v438_v56 = vpop.f32.mrb[14].mxu0 }
 0x12b   : > { %1516 = vtanh.f32 %v435_v52  ;;  %v439_v57 = vadd.f32 %v438_v56, %v1992_v14  ;;  %v440_v58 = vpop.f32.mrb[15].mxu0  ;;  %777 = vmatprep.mubr.bf16.mxu1 %v518_v54 }
 0x12c   : > { %1518 = vtanh.f32 %v437_v55  ;;  %v441_v59 = vadd.f32 %v440_v58, %v1996_v15  ;;  %778 = vmatmul.mubr.bf16.gmra.mrb[4].mxu1 %v517_v51 }
 0x12d   : > { %v1509_v60 = vpop.eup %1508  ;;  %1520 = vtanh.f32 %v439_v57 }
 0x12e   : > { %v1511_v61 = vpop.eup %1510  ;;  %1522 = vtanh.f32 %v441_v59 }
 0x12f   : > { %v1513_v62 = vpop.eup %1512 }
 0x130   : > { %v1515_v63 = vpop.eup %1514  ;;  %v444_v0 = vpop.f32.mrb[16].mxu0  ;;  %v519_v1 = vpack.c.bf16 %v1513_v62, %v1509_v60 }
 0x131   : > { %v445_v2 = vadd.f32 %v444_v0, %v1992_v14  ;;  %v446_v3 = vpop.f32.mrb[17].mxu0  ;;  %v520_v4 = vpack.c.bf16 %v1515_v63, %v1511_v61 }
 0x132   : > { %v447_v5 = vadd.f32 %v446_v3, %v1996_v15  ;;  %v448_v6 = vpop.f32.mrb[18].mxu0 }
 0x133   : > { %1524 = vtanh.f32 %v445_v2  ;;  %v449_v7 = vadd.f32 %v448_v6, %v1992_v14  ;;  %v450_v8 = vpop.f32.mrb[19].mxu0  ;;  %787 = vmatprep.mubr.bf16.mxu1 %v520_v4  ;;  %v1489_v4 = vld [vmem:[#allocation2 + $0x30] sm:$0xff]   ;;  %v1491_v6 = vld [vmem:[#allocation2 + $0x38] sm:$0xff]  }
 0x134   : > { %1526 = vtanh.f32 %v447_v5  ;;  %v451_v9 = vadd.f32 %v450_v8, %v1996_v15  ;;  %788 = vmatmul.mubr.bf16.gmra.mrb[8].mxu1 %v519_v1  ;;  %v1490_v5 = vld [vmem:[#allocation2 + $0x78] sm:$0xff]  }
 0x135   : > { %v1517_v12 = vpop.eup %1516  ;;  %1528 = vtanh.f32 %v449_v7  ;;  %v563_v7 = vld [vmem:[%s2171_s4] sm:$0x3] }
 0x136   : > { %v1519_v16 = vpop.eup %1518  ;;  %1530 = vtanh.f32 %v451_v9  ;;  %v2035_v8 = vrot.slane %v563_v7, %v325_v11  ;;  %v2039_v9 = vrot.slane %v563_v7, %v329_v13 }
 0x137   : > { %v1521_v17 = vpop.eup %1520 }
 0x138   : > { %v1523_v18 = vpop.eup %1522  ;;  %v454_v19 = vpop.f32.mrb[20].mxu0  ;;  %v521_v20 = vpack.c.bf16 %v1521_v17, %v1517_v12 }
 0x139   : > { %v455_v21 = vadd.f32 %v454_v19, %v1992_v14  ;;  %v456_v22 = vpop.f32.mrb[21].mxu0  ;;  %v522_v23 = vpack.c.bf16 %v1523_v18, %v1519_v16 }
 0x13a   : > { %v457_v24 = vadd.f32 %v456_v22, %v1996_v15  ;;  %v458_v25 = vpop.f32.mrb[22].mxu0 }
 0x13b   : > { %1532 = vtanh.f32 %v455_v21  ;;  %v459_v26 = vadd.f32 %v458_v25, %v1992_v14  ;;  %v460_v27 = vpop.f32.mrb[23].mxu0  ;;  %797 = vmatprep.mubr.bf16.mxu1 %v522_v23 }
 0x13c   : > { %1534 = vtanh.f32 %v457_v24  ;;  %v461_v28 = vadd.f32 %v460_v27, %v1996_v15  ;;  %798 = vmatmul.mubr.bf16.gmra.mrb[12].mxu1 %v521_v20 }
 0x13d   : > { %v1525_v29 = vpop.eup %1524  ;;  %1536 = vtanh.f32 %v459_v26 }
 0x13e   : > { %v1527_v30 = vpop.eup %1526  ;;  %1538 = vtanh.f32 %v461_v28 }
 0x13f   : > { %v1529_v31 = vpop.eup %1528 }
 0x140   : > { %v1531_v32 = vpop.eup %1530  ;;  %v464_v33 = vpop.f32.mrb[24].mxu0  ;;  %v523_v34 = vpack.c.bf16 %v1529_v31, %v1525_v29 }
 0x141   : > { %v465_v35 = vadd.f32 %v464_v33, %v1992_v14  ;;  %v466_v36 = vpop.f32.mrb[25].mxu0  ;;  %v524_v37 = vpack.c.bf16 %v1531_v32, %v1527_v30 }
 0x142   : > { %v467_v38 = vadd.f32 %v466_v36, %v1996_v15  ;;  %v468_v39 = vpop.f32.mrb[26].mxu0 }
 0x143   : > { %1540 = vtanh.f32 %v465_v35  ;;  %v469_v40 = vadd.f32 %v468_v39, %v1992_v14  ;;  %v470_v41 = vpop.f32.mrb[27].mxu0  ;;  %807 = vmatprep.mubr.bf16.mxu1 %v524_v37 }
 0x144   : > { %1542 = vtanh.f32 %v467_v38  ;;  %v471_v42 = vadd.f32 %v470_v41, %v1996_v15  ;;  %808 = vmatmul.mubr.bf16.gmra.mrb[16].mxu1 %v523_v34 }
 0x145   : > { %v1533_v43 = vpop.eup %1532  ;;  %1544 = vtanh.f32 %v469_v40 }
 0x146   : > { %v1535_v44 = vpop.eup %1534  ;;  %1546 = vtanh.f32 %v471_v42 }
 0x147   : > { %v1537_v45 = vpop.eup %1536 }
 0x148   : > { %v1539_v46 = vpop.eup %1538  ;;  %v474_v47 = vpop.f32.mrb[28].mxu0  ;;  %v525_v48 = vpack.c.bf16 %v1537_v45, %v1533_v43 }
 0x149   : > { %v475_v49 = vadd.f32 %v474_v47, %v1992_v14  ;;  %v476_v50 = vpop.f32.mrb[29].mxu0  ;;  %v526_v51 = vpack.c.bf16 %v1539_v46, %v1535_v44 }
 0x14a   : > { %v477_v52 = vadd.f32 %v476_v50, %v1996_v15  ;;  %v478_v53 = vpop.f32.mrb[30].mxu0 }
 0x14b   : > { %1548 = vtanh.f32 %v475_v49  ;;  %v479_v54 = vadd.f32 %v478_v53, %v1992_v14  ;;  %v480_v55 = vpop.f32.mrb[31].mxu0  ;;  %817 = vmatprep.mubr.bf16.mxu1 %v526_v51 }
 0x14c   : > { %1550 = vtanh.f32 %v477_v52  ;;  %v481_v56 = vadd.f32 %v480_v55, %v1996_v15  ;;  %818 = vmatmul.mubr.bf16.gmra.mrb[20].mxu1 %v525_v48  ;;  %v1488_v15 = vld [vmem:[#allocation2 + $0x70] sm:$0xff]  }
 0x14d   : > { %v1541_v57 = vpop.eup %1540  ;;  %1552 = vtanh.f32 %v479_v54  ;;  %1319 = vmatprep.subr.bf16.mxu0 %v1488_v15 }
 0x14e   : > { %v1543_v58 = vpop.eup %1542  ;;  %1554 = vtanh.f32 %v481_v56  ;;  %1320 = vmatpush3.bf16.msra.mxu0 %v1489_v4 }
 0x14f   : > { %v1545_v59 = vpop.eup %1544  ;;  %1321 = vmatprep.subr.bf16.mxu0 %v1490_v5 }
 0x150   : > { %v1547_v60 = vpop.eup %1546  ;;  %v527_v61 = vpack.c.bf16 %v1545_v59, %v1541_v57 }
 0x151   : > { %v528_v62 = vpack.c.bf16 %v1547_v60, %v1543_v58 }
 0x152   : > { %1322 = vmatpush3.bf16.msra.mxu0 %v1491_v6 }
 0x153   : > { %827 = vmatprep.mubr.bf16.mxu1 %v528_v62 }
 0x154   : > { %828 = vmatmul.mubr.bf16.gmra.mrb[24].mxu1 %v527_v61 }
 0x155   : > { %v1549_v63 = vpop.eup %1548 }
 0x156   : > { %v1551_v0 = vpop.eup %1550 }
 0x157   : > { %v1553_v1 = vpop.eup %1552 }
 0x158   : > { %v1555_v14 = vpop.eup %1554  ;;  %v529_v2 = vpack.c.bf16 %v1553_v1, %v1549_v63 }
 0x159   : > { %v530_v3 = vpack.c.bf16 %v1555_v14, %v1551_v0 }
 0x15b   : > { %837 = vmatprep.mubr.bf16.mxu1 %v530_v3 }
 0x15c   : > { %838 = vmatmul.mubr.bf16.gmra.mrb[28].mxu1 %v529_v2 }
 0x1f7   : > { %v769_v12 = vpop.f32.mrb[0].mxu1 }
 0x1f8   : > { %v770_v16 = vadd.f32 %v769_v12, %v2035_v8  ;;  %v771_v17 = vpop.f32.mrb[1].mxu1 }
 0x1f9   : > { %v772_v18 = vadd.f32 %v771_v17, %v2039_v9  ;;  %v773_v19 = vpop.f32.mrb[2].mxu1 }
 0x1fa   : > { %1556 = vtanh.f32 %v770_v16  ;;  %v774_v20 = vadd.f32 %v773_v19, %v2035_v8  ;;  %v775_v21 = vpop.f32.mrb[3].mxu1 }
 0x1fb   : > { %1558 = vtanh.f32 %v772_v18  ;;  %v776_v22 = vadd.f32 %v775_v21, %v2039_v9 }
 0x1fc   : > { %1560 = vtanh.f32 %v774_v20 }
 0x1fd   : > { %1562 = vtanh.f32 %v776_v22 }
 0x1ff   : > { %v779_v11 = vpop.f32.mrb[4].mxu1 }
 0x200   : > { %v780_v10 = vadd.f32 %v779_v11, %v2035_v8  ;;  %v781_v13 = vpop.f32.mrb[5].mxu1 }
 0x201   : > { %v782_v23 = vadd.f32 %v781_v13, %v2039_v9  ;;  %v783_v24 = vpop.f32.mrb[6].mxu1 }
 0x202   : > { %1564 = vtanh.f32 %v780_v10  ;;  %v784_v25 = vadd.f32 %v783_v24, %v2035_v8  ;;  %v785_v26 = vpop.f32.mrb[7].mxu1 }
 0x203   : > { %1566 = vtanh.f32 %v782_v23  ;;  %v786_v27 = vadd.f32 %v785_v26, %v2039_v9 }
 0x204   : > { %v1557_v28 = vpop.eup %1556  ;;  %1568 = vtanh.f32 %v784_v25 }
 0x205   : > { %v1559_v29 = vpop.eup %1558  ;;  %1570 = vtanh.f32 %v786_v27 }
 0x206   : > { %v1561_v30 = vpop.eup %1560 }
 0x207   : > { %v1563_v31 = vpop.eup %1562  ;;  %v789_v32 = vpop.f32.mrb[8].mxu1  ;;  %v880_v33 = vpack.c.bf16 %v1561_v30, %v1557_v28 }
 0x208   : > { %v790_v34 = vadd.f32 %v789_v32, %v2035_v8  ;;  %v791_v35 = vpop.f32.mrb[9].mxu1  ;;  %v881_v36 = vpack.c.bf16 %v1563_v31, %v1559_v29 }
 0x209   : > { %v792_v37 = vadd.f32 %v791_v35, %v2039_v9  ;;  %v793_v38 = vpop.f32.mrb[10].mxu1 }
 0x20a   : > { %1572 = vtanh.f32 %v790_v34  ;;  %v794_v39 = vadd.f32 %v793_v38, %v2035_v8  ;;  %v795_v40 = vpop.f32.mrb[11].mxu1  ;;  %1063 = vmatprep.mubr.bf16.mxu0 %v881_v36 }
 0x20b   : > { %1574 = vtanh.f32 %v792_v37  ;;  %v796_v41 = vadd.f32 %v795_v40, %v2039_v9  ;;  %1064 = vmatmul.mubr.bf16.vlgmr.msra.gmra.mrb[32].mxu0 %v880_v33 }
 0x20c   : > { %v1565_v42 = vpop.eup %1564  ;;  %1576 = vtanh.f32 %v794_v39 }
 0x20d   : > { %v1567_v43 = vpop.eup %1566  ;;  %1578 = vtanh.f32 %v796_v41 }
 0x20e   : > { %v1569_v44 = vpop.eup %1568 }
 0x20f   : > { %v1571_v45 = vpop.eup %1570  ;;  %v799_v46 = vpop.f32.mrb[12].mxu1  ;;  %v882_v47 = vpack.c.bf16 %v1569_v44, %v1565_v42 }
 0x210   : > { %v800_v48 = vadd.f32 %v799_v46, %v2035_v8  ;;  %v801_v49 = vpop.f32.mrb[13].mxu1  ;;  %v883_v50 = vpack.c.bf16 %v1571_v45, %v1567_v43 }
 0x211   : > { %v802_v51 = vadd.f32 %v801_v49, %v2039_v9  ;;  %v803_v52 = vpop.f32.mrb[14].mxu1 }
 0x212   : > { %1580 = vtanh.f32 %v800_v48  ;;  %v804_v53 = vadd.f32 %v803_v52, %v2035_v8  ;;  %v805_v54 = vpop.f32.mrb[15].mxu1  ;;  %1071 = vmatprep.mubr.bf16.mxu0 %v883_v50 }
 0x213   : > { %1582 = vtanh.f32 %v802_v51  ;;  %v806_v55 = vadd.f32 %v805_v54, %v2039_v9  ;;  %1072 = vmatmul.mubr.bf16.gmra.mrb[36].mxu0 %v882_v47 }
 0x214   : > { %v1573_v56 = vpop.eup %1572  ;;  %1584 = vtanh.f32 %v804_v53 }
 0x215   : > { %v1575_v57 = vpop.eup %1574  ;;  %1586 = vtanh.f32 %v806_v55 }
 0x216   : > { %v1577_v58 = vpop.eup %1576 }
 0x217   : > { %v1579_v59 = vpop.eup %1578  ;;  %v809_v60 = vpop.f32.mrb[16].mxu1  ;;  %v884_v61 = vpack.c.bf16 %v1577_v58, %v1573_v56 }
 0x218   : > { %v810_v62 = vadd.f32 %v809_v60, %v2035_v8  ;;  %v811_v63 = vpop.f32.mrb[17].mxu1  ;;  %v885_v0 = vpack.c.bf16 %v1579_v59, %v1575_v57 }
 0x219   : > { %v812_v1 = vadd.f32 %v811_v63, %v2039_v9  ;;  %v813_v14 = vpop.f32.mrb[18].mxu1 }
 0x21a   : > { %1588 = vtanh.f32 %v810_v62  ;;  %v814_v2 = vadd.f32 %v813_v14, %v2035_v8  ;;  %v815_v3 = vpop.f32.mrb[19].mxu1  ;;  %1079 = vmatprep.mubr.bf16.mxu0 %v885_v0 }
 0x21b   : > { %1590 = vtanh.f32 %v812_v1  ;;  %v816_v15 = vadd.f32 %v815_v3, %v2039_v9  ;;  %1080 = vmatmul.mubr.bf16.gmra.mrb[40].mxu0 %v884_v61  ;;  %v2079_v61 = vld [vmem:[%s2173_s6] ss:$0 sm:$0xff] }
 0x21c   : > { %v1581_v4 = vpop.eup %1580  ;;  %1592 = vtanh.f32 %v814_v2 }
 0x21d   : > { %v1583_v5 = vpop.eup %1582  ;;  %1594 = vtanh.f32 %v816_v15 }
 0x21e   : > { %v1585_v6 = vpop.eup %1584 }
 0x21f   : > { %v1587_v7 = vpop.eup %1586  ;;  %v819_v12 = vpop.f32.mrb[20].mxu1  ;;  %v886_v16 = vpack.c.bf16 %v1585_v6, %v1581_v4 }
 0x220   : > { %v820_v17 = vadd.f32 %v819_v12, %v2035_v8  ;;  %v821_v18 = vpop.f32.mrb[21].mxu1  ;;  %v887_v19 = vpack.c.bf16 %v1587_v7, %v1583_v5 }
 0x221   : > { %v822_v20 = vadd.f32 %v821_v18, %v2039_v9  ;;  %v823_v21 = vpop.f32.mrb[22].mxu1 }
 0x222   : > { %1596 = vtanh.f32 %v820_v17  ;;  %v824_v22 = vadd.f32 %v823_v21, %v2035_v8  ;;  %v825_v11 = vpop.f32.mrb[23].mxu1  ;;  %1087 = vmatprep.mubr.bf16.mxu0 %v887_v19 }
 0x223   : > { %1598 = vtanh.f32 %v822_v20  ;;  %v826_v10 = vadd.f32 %v825_v11, %v2039_v9  ;;  %1088 = vmatmul.mubr.bf16.gmra.mrb[44].mxu0 %v886_v16 }
 0x224   : > { %v1589_v13 = vpop.eup %1588  ;;  %1600 = vtanh.f32 %v824_v22 }
 0x225   : > { %v1591_v23 = vpop.eup %1590  ;;  %1602 = vtanh.f32 %v826_v10 }
 0x226   : > { %v1593_v24 = vpop.eup %1592 }
 0x227   : > { %v1595_v25 = vpop.eup %1594  ;;  %v829_v26 = vpop.f32.mrb[24].mxu1  ;;  %v888_v27 = vpack.c.bf16 %v1593_v24, %v1589_v13 }
 0x228   : > { %v830_v28 = vadd.f32 %v829_v26, %v2035_v8  ;;  %v831_v29 = vpop.f32.mrb[25].mxu1  ;;  %v889_v30 = vpack.c.bf16 %v1595_v25, %v1591_v23 }
 0x229   : > { %v832_v31 = vadd.f32 %v831_v29, %v2039_v9  ;;  %v833_v32 = vpop.f32.mrb[26].mxu1 }
 0x22a   : > { %1604 = vtanh.f32 %v830_v28  ;;  %v834_v33 = vadd.f32 %v833_v32, %v2035_v8  ;;  %v835_v34 = vpop.f32.mrb[27].mxu1  ;;  %1095 = vmatprep.mubr.bf16.mxu0 %v889_v30 }
 0x22b   : > { %1606 = vtanh.f32 %v832_v31  ;;  %v836_v35 = vadd.f32 %v835_v34, %v2039_v9  ;;  %1096 = vmatmul.mubr.bf16.gmra.mrb[48].mxu0 %v888_v27 }
 0x22c   : > { %v1597_v36 = vpop.eup %1596  ;;  %1608 = vtanh.f32 %v834_v33 }
 0x22d   : > { %v1599_v37 = vpop.eup %1598  ;;  %1610 = vtanh.f32 %v836_v35 }
 0x22e   : > { %v1601_v38 = vpop.eup %1600 }
 0x22f   : > { %v1603_v39 = vpop.eup %1602  ;;  %v839_v40 = vpop.f32.mrb[28].mxu1  ;;  %v890_v41 = vpack.c.bf16 %v1601_v38, %v1597_v36 }
 0x230   : > { %v840_v42 = vadd.f32 %v839_v40, %v2035_v8  ;;  %v841_v43 = vpop.f32.mrb[29].mxu1  ;;  %v891_v44 = vpack.c.bf16 %v1603_v39, %v1599_v37 }
 0x231   : > { %v842_v45 = vadd.f32 %v841_v43, %v2039_v9  ;;  %v843_v46 = vpop.f32.mrb[30].mxu1 }
 0x232   : > { %1612 = vtanh.f32 %v840_v42  ;;  %v844_v47 = vadd.f32 %v843_v46, %v2035_v8  ;;  %v845_v48 = vpop.f32.mrb[31].mxu1  ;;  %1103 = vmatprep.mubr.bf16.mxu0 %v891_v44 }
 0x233   : > { %1614 = vtanh.f32 %v842_v45  ;;  %v846_v49 = vadd.f32 %v845_v48, %v2039_v9  ;;  %1104 = vmatmul.mubr.bf16.gmra.mrb[52].mxu0 %v890_v41 }
 0x234   : > { %v1605_v50 = vpop.eup %1604  ;;  %1616 = vtanh.f32 %v844_v47 }
 0x235   : > { %v1607_v51 = vpop.eup %1606  ;;  %1618 = vtanh.f32 %v846_v49 }
 0x236   : > { %v1609_v52 = vpop.eup %1608 }
 0x237   : > { %v1611_v53 = vpop.eup %1610  ;;  %v892_v54 = vpack.c.bf16 %v1609_v52, %v1605_v50 }
 0x238   : > { %v893_v55 = vpack.c.bf16 %v1611_v53, %v1607_v51 }
 0x23a   : > { %1111 = vmatprep.mubr.bf16.mxu0 %v893_v55 }
 0x23b   : > { %1112 = vmatmul.mubr.bf16.gmra.mrb[56].mxu0 %v892_v54 }
 0x23c   : > { %v1613_v56 = vpop.eup %1612 }
 0x23d   : > { %v1615_v8 = vpop.eup %1614 }
 0x23e   : > { %v1617_v57 = vpop.eup %1616 }
 0x23f   : > { %v1619_v58 = vpop.eup %1618  ;;  %v894_v59 = vpack.c.bf16 %v1617_v57, %v1613_v56 }
 0x240   : > { %v895_v60 = vpack.c.bf16 %v1619_v58, %v1615_v8 }
 0x242   : > { %1119 = vmatprep.mubr.bf16.mxu0 %v895_v60 }
 0x243   : > { %1120 = vmatmul.mubr.bf16.gmra.mrb[60].mxu0 %v894_v59 }
 0x2de   : > { %v1323_v9 = vpop.f32.mrb[32].mxu0 }
 0x2df   : > { %v1324_v62 = vpop.f32.mrb[33].mxu0 }
 0x2e0   : > { %v1325_v63 = vadd.f32 %v1324_v62, %v1323_v9  ;;  %v1326_v0 = vpop.f32.mrb[34].mxu0 }
 0x2e1   : > { %v1327_v1 = vpop.f32.mrb[35].mxu0 }
 0x2e2   : > { %v1066_v14 = vadd.f32 %v1325_v63, %v2079_v61  ;;  %v1328_v2 = vadd.f32 %v1327_v1, %v1326_v0 }
 0x2e4   : > { %1128 = vst [vmem:[%s2082_s14] sm:$0xff] %v1066_v14  ;;  %v1069_v3 = vadd.f32 %v1328_v2, %v2079_v61 }
 0x2e6   : > { %1129 = vst [vmem:[%s2082_s14 + $0x8] sm:$0xff] %v1069_v3  ;;  %v1329_v15 = vpop.f32.mrb[36].mxu0 }
 0x2e7   : > { %v1330_v4 = vpop.f32.mrb[37].mxu0 }
 0x2e8   : > { %v1331_v5 = vadd.f32 %v1330_v4, %v1329_v15  ;;  %v1332_v6 = vpop.f32.mrb[38].mxu0 }
 0x2e9   : > { %v1333_v7 = vpop.f32.mrb[39].mxu0 }
 0x2ea   : > { %v1074_v12 = vadd.f32 %v1331_v5, %v2079_v61  ;;  %v1334_v16 = vadd.f32 %v1333_v7, %v1332_v6 }
 0x2ec   : > { %1130 = vst [vmem:[%s2082_s14 + $0x10] sm:$0xff] %v1074_v12  ;;  %v1077_v17 = vadd.f32 %v1334_v16, %v2079_v61 }
 0x2ee   : > { %1131 = vst [vmem:[%s2082_s14 + $0x18] sm:$0xff] %v1077_v17  ;;  %v1335_v18 = vpop.f32.mrb[40].mxu0 }
 0x2ef   : > { %v1336_v19 = vpop.f32.mrb[41].mxu0 }
 0x2f0   : > { %v1337_v20 = vadd.f32 %v1336_v19, %v1335_v18  ;;  %v1338_v21 = vpop.f32.mrb[42].mxu0 }
 0x2f1   : > { %v1339_v22 = vpop.f32.mrb[43].mxu0 }
 0x2f2   : > { %v1082_v11 = vadd.f32 %v1337_v20, %v2079_v61  ;;  %v1340_v10 = vadd.f32 %v1339_v22, %v1338_v21 }
 0x2f4   : > { %1132 = vst [vmem:[%s2082_s14 + $0x20] sm:$0xff] %v1082_v11  ;;  %v1085_v13 = vadd.f32 %v1340_v10, %v2079_v61 }
 0x2f6   : > { %1133 = vst [vmem:[%s2082_s14 + $0x28] sm:$0xff] %v1085_v13  ;;  %v1341_v23 = vpop.f32.mrb[44].mxu0 }
 0x2f7   : > { %v1342_v24 = vpop.f32.mrb[45].mxu0 }
 0x2f8   : > { %v1343_v25 = vadd.f32 %v1342_v24, %v1341_v23  ;;  %v1344_v26 = vpop.f32.mrb[46].mxu0 }
 0x2f9   : > { %v1345_v27 = vpop.f32.mrb[47].mxu0 }
 0x2fa   : > { %v1090_v28 = vadd.f32 %v1343_v25, %v2079_v61  ;;  %v1346_v29 = vadd.f32 %v1345_v27, %v1344_v26 }
 0x2fc   : > { %1134 = vst [vmem:[%s2082_s14 + $0x30] sm:$0xff] %v1090_v28  ;;  %v1093_v30 = vadd.f32 %v1346_v29, %v2079_v61 }
 0x2fe   : > { %1135 = vst [vmem:[%s2082_s14 + $0x38] sm:$0xff] %v1093_v30  ;;  %v1347_v31 = vpop.f32.mrb[48].mxu0 }
 0x2ff   : > { %v1348_v32 = vpop.f32.mrb[49].mxu0 }
 0x300   : > { %v1349_v33 = vadd.f32 %v1348_v32, %v1347_v31  ;;  %v1350_v34 = vpop.f32.mrb[50].mxu0 }
 0x301   : > { %v1351_v35 = vpop.f32.mrb[51].mxu0 }
 0x302   : > { %v1098_v36 = vadd.f32 %v1349_v33, %v2079_v61  ;;  %v1352_v37 = vadd.f32 %v1351_v35, %v1350_v34 }
 0x304   : > { %1136 = vst [vmem:[%s2082_s14 + $0x40] sm:$0xff] %v1098_v36  ;;  %v1101_v38 = vadd.f32 %v1352_v37, %v2079_v61 }
 0x306   : > { %1137 = vst [vmem:[%s2082_s14 + $0x48] sm:$0xff] %v1101_v38  ;;  %v1353_v39 = vpop.f32.mrb[52].mxu0 }
 0x307   : > { %v1354_v40 = vpop.f32.mrb[53].mxu0 }
 0x308   : > { %v1355_v41 = vadd.f32 %v1354_v40, %v1353_v39  ;;  %v1356_v42 = vpop.f32.mrb[54].mxu0 }
 0x309   : > { %v1357_v43 = vpop.f32.mrb[55].mxu0 }
 0x30a   : > { %v1106_v44 = vadd.f32 %v1355_v41, %v2079_v61  ;;  %v1358_v45 = vadd.f32 %v1357_v43, %v1356_v42 }
 0x30c   : > { %1138 = vst [vmem:[%s2082_s14 + $0x50] sm:$0xff] %v1106_v44  ;;  %v1109_v46 = vadd.f32 %v1358_v45, %v2079_v61 }
 0x30e   : > { %1139 = vst [vmem:[%s2082_s14 + $0x58] sm:$0xff] %v1109_v46  ;;  %v1359_v47 = vpop.f32.mrb[56].mxu0 }
 0x30f   : > { %v1360_v48 = vpop.f32.mrb[57].mxu0 }
 0x310   : > { %v1361_v49 = vadd.f32 %v1360_v48, %v1359_v47  ;;  %v1362_v50 = vpop.f32.mrb[58].mxu0 }
 0x311   : > { %v1363_v51 = vpop.f32.mrb[59].mxu0 }
 0x312   : > { %v1114_v52 = vadd.f32 %v1361_v49, %v2079_v61  ;;  %v1364_v53 = vadd.f32 %v1363_v51, %v1362_v50 }
 0x314   : > { %1140 = vst [vmem:[%s2082_s14 + $0x60] sm:$0xff] %v1114_v52  ;;  %v1117_v54 = vadd.f32 %v1364_v53, %v2079_v61 }
 0x316   : > { %1141 = vst [vmem:[%s2082_s14 + $0x68] sm:$0xff] %v1117_v54  ;;  %v1365_v55 = vpop.f32.mrb[60].mxu0 }
 0x317   : > { %v1366_v56 = vpop.f32.mrb[61].mxu0 }
 0x318   : > { %v1367_v8 = vadd.f32 %v1366_v56, %v1365_v55  ;;  %v1368_v57 = vpop.f32.mrb[62].mxu0 }
 0x319   : > { %v1369_v58 = vpop.f32.mrb[63].mxu0 }
 0x31a   : > { %v1122_v59 = vadd.f32 %v1367_v8, %v2079_v61  ;;  %v1370_v60 = vadd.f32 %v1369_v58, %v1368_v57 }
 0x31c   : > { %1142 = vst [vmem:[%s2082_s14 + $0x70] sm:$0xff] %v1122_v59  ;;  %v1125_v9 = vadd.f32 %v1370_v60, %v2079_v61 }
 0x31e   : > { %1143 = vst [vmem:[%s2082_s14 + $0x78] sm:$0xff] %v1125_v9 }
 0x31f   : > { %1661 = shalt.err (!%p1658_p7)
}
 0x320   : > { %s1662_s23 = scalar_lea.hbm %s2117_s20, 2048  ;;  %s1666_s9 = scalar_lea.hbm %s2174_s7, 4096 }
 0x321   : > { %p1663_p8 = scmp.ne.s32.totalorder %s2117_s20, %s1662_s23  ;;  %p1667_p1 = scmp.lt.u32.totalorder %s2117_s20, %s2174_s7 }
 0x322   : > { %p1668_p0 = scmp.lt.u32.totalorder %s1666_s9, %s1662_s23  ;;  %p1670_p6 = scmp.lt.u32.totalorder %s1662_s23, %s2117_s20 }
 0x323   : > { %p1664_p11 = pnand %p1663_p8, %p2185_p9 }
 0x324   : > { %p1669_p5 = por %p1668_p0, %p1667_p1 }
 0x325   : > { %p1665_p13 = pneg %p1664_p11 }
 0x326   : > { %p1671_p10 = por %p1670_p6, %p1669_p5 }
 0x328   : > { %p1672_p12 = pnand %p1671_p10, %p1665_p13 }
 0x32a   : > { %1675 = shalt.err (!%p1672_p12)
}
 0x32b   : > { %s1721_s16 = smov 128   ;;  %s1722_s19 = smov 8  }
 0x32c   : > { %1375 = dma.vmem_to_hbm [thread:$0]  (%p2185_p9), %s2119_s18, 2048, %s2117_s20, %s2126_s28, %s1721_s16, %s1721_s16, %s1722_s19  }
 0x32d PF: > { %p1387_p2 = scmp.ge.s32.totalorder %s1714_s27, 2  ;;  %s1173_s13 = sand.u32 1, %s1702_s24  }
 0x32e   : > { %p2186_p3 = scmp.ne.s32.totalorder %s2179_s12, 0  ;;  %s1174_s21 = scalar_lea.sflag [#allocation4], %s1173_s13 }
 0x330   : > { %p1382_p4 = pnand %p1387_p2, %p2186_p3 }
 0x332   : > { %1697 = dma.done.wait (!%p1382_p4), %s1174_s21, 2048  }
 0x333   : > { %1699 = vsyncadd (!%p1382_p4), %s1174_s21, 4294965248  ;;  %p18_p7 = scmp.ge.s32.totalorder %s1788_s30, 4   ;;  %s2187_s24 = smov %s1706_s25 }
 0x334   : > { %s2188_s25 = smov %s1710_s26  ;;  %s2189_s26 = smov %s1799_s10 }
 0x335   : > { %s2190_s27 = smov %s1788_s30  ;;  %20 = sbr.rel (!%p18_p7) target bundleno = 4 (0x4), region = 88 }
 0x33c   :  { %1179 = vsyncpa [#allocation3], 1 }
 0x33d   :  { %1181 = vsyncpa [#allocation3 + $0x1], 1 }
 0x33e   :  { %1182 = vsyncpa [#allocation4], 1 }
 0x33f   :  { %1184 = vsyncpa [#allocation4 + $0x1], 1 }

// kernel: tpu_custom_call.1
= control target key start
LH: loop header
LB: loop body
LE: loop exit
PB: predicated region body
PF: predicated region fallthrough
CT: control target
= control target key end

     0   :  { %12 = vsyncpa [#allocation3], 0  ;;  %s2167_s0 = inlined_call_operand.vmem [shape: f32[256,8], index: 0, kind: input, shape index: {}]   ;;  %s2168_s1 = inlined_call_operand.vmem [shape: bf16[8,256], index: 1, kind: input, shape index: {}]   ;;  %s2169_s2 = inlined_call_operand.vmem [shape: f32[1,256], index: 2, kind: input, shape index: {}]   ;;  %s2170_s3 = inlined_call_operand.vmem [shape: bf16[256,256], index: 3, kind: input, shape index: {}]   ;;  %s2171_s4 = inlined_call_operand.vmem [shape: f32[1,256], index: 4, kind: input, shape index: {}]   ;;  %s2172_s5 = inlined_call_operand.hbm [shape: bf16[256,128], index: 5, kind: input, shape index: {}]   ;;  %s2173_s6 = inlined_call_operand.vmem [shape: f32[1,128], index: 6, kind: input, shape index: {}]   ;;  %s2174_s7 = inlined_call_operand.hbm [shape: f32[256,128], index: 7, kind: output, shape index: {}]  }
   0x1   :  { %13 = vsyncpa [#allocation4], 0 }
   0x2   :  { %15 = vsyncpa [#allocation4 + $0x1], 0  ;;  %s1763_s24 = smov 0   ;;  %s1765_s25 = smov 0  }
   0x3   :  { %s1767_s26 = smov 0   ;;  %s1769_s27 = smov 0  }
   0x4 LB: > { %s1784_s28 = sadd.s32 4294967295, %s1714_s27   ;;  %s1232_s29 = sadd.s32 4294967294, %s1714_s27   ;;  %s1714_s27 = sphi %s1769_s27, %s2190_s27   ;;  %s1710_s26 = sphi %s1767_s26, %s2189_s26   ;;  %s1706_s25 = sphi %s1765_s25, %s2188_s25   ;;  %s1702_s24 = sphi %s1763_s24, %s2187_s24  }
   0x5   : > { %s1788_s30 = sadd.s32 1, %s1714_s27   ;;  %s180_s8 = sadd.s32 1, %s1710_s26 }
   0x6   : > { %s177_s9 = ssub.s32 %s1714_s27, %s1788_s30  ;;  %p190_p0 = scmp.ne.s32.totalorder %s1710_s26, %s1706_s25 }
   0x7   : > { %p178_p1 = scmp.eq.s32.totalorder %s177_s9, 0  ;;  %p191_p2 = scmp.eq.s32.totalorder %s1784_s28, 1 }
   0x8   : > { %p196_p3 = scmp.ne.s32.totalorder %s1706_s25, %s1702_s24  ;;  %p197_p4 = scmp.eq.s32.totalorder %s1232_s29, 1 }
   0x9   : > { %s1799_s10 = scalar_select %p178_p1, %s1710_s26, %s180_s8  }
   0xa   : > { %p1801_p5 = por %p191_p2, %p190_p0  ;;  %p1805_p6 = por %p197_p4, %p196_p3 }
   0xb   : > { %p1233_p7 = scmp.ge.s32.totalorder %s1714_s27, 1  ;;  %p204_p8 = scmp.lt.s32.totalorder %s1714_s27, 3 }
   0xc   : > { %s2178_s11 = scalar_select %p1801_p5, 1, 0 }
   0xd   : > { %s2179_s12 = scalar_select %p1805_p6, 1, 0 }
   0xe   : > { %p2175_p9 = scmp.eq.s32.totalorder %s1784_s28, 0  ;;  %p1812_p10 = pnand %p1233_p7, %p204_p8 }
   0xf   : > { %s1716_s14 = smov [#allocation2]   ;;  %s1620_s19 = scalar_lea.hbm %s2172_s5, 2048 }
  0x10   : > { %s2180_s13 = scalar_select %p1812_p10, 1, 0 }
  0x11   : > { %s228_s15 = sshll.u32 %s1716_s14, 4  ;;  %p1377_p11 = pneg %p1812_p10  ;;  %s229_s15 = int_to_ptr.vmem [resolvable:$true] %s228_s15 }
  0x12   : > { %p1621_p13 = scmp.ne.s32.totalorder %s2172_s5, %s1620_s19  ;;  %p1627_p3 = scmp.lt.u32.totalorder %s1620_s19, %s2172_s5 }
  0x13   : > { %p1820_p12 = pnand %p2175_p9, %p1377_p11 }
  0x15   : > { %p1622_p0 = pneg %p1820_p12 }
  0x17   : > { %p1623_p1 = pnand %p1622_p0, %p1621_p13 }
  0x19   : > { %p1624_p2 = pneg %p1623_p1 }
  0x1b   : > { %p1629_p4 = pnand %p1627_p3, %p1624_p2 }
  0x1d   : > { %1632 = shalt.err (!%p1629_p4)
}
  0x1e   : > { %s1633_s29 = scalar_lea.vmem %s229_s15, 2048  ;;  %p1641_p9 = scmp.lt.s32.totalorder %s229_s15, %s229_s15 }
  0x1f   : > { %p1634_p7 = scmp.ne.s32.totalorder %s229_s15, %s1633_s29  ;;  %p1642_p6 = scmp.lt.s32.totalorder %s1633_s29, %s1633_s29 }
  0x21   : > { %p1636_p8 = pnand %p1634_p7, %p1622_p0  ;;  %p1643_p5 = por %p1642_p6, %p1641_p9 }
  0x23   : > { %p1637_p11 = pneg %p1636_p8 }
  0x25   : > { %p1644_p10 = pnand %p1643_p5, %p1637_p11 }
  0x27   : > { %1647 = shalt.err (!%p1644_p10)
}
  0x28   : > { %s1717_s8 = smov 64   ;;  %s1718_s9 = smov 4  }
  0x29   : > { %1380 = dma.hbm_to_vmem [thread:$0]  (!%p1820_p12), %s2172_s5, 2048, %s229_s15, [#allocation3], %s1717_s8, %s1717_s8, %s1718_s9  }
  0x2a   : > { %p2182_p13 = scmp.ne.s32.totalorder %s2180_s13, 0 }
  0x2b   : > { %p2183_p1 = scmp.eq.s32.totalorder (!%p2182_p13), %s1784_s28, 0 }
  0x2c   : > { %256 = sbr.rel (%p2182_p13) target bundleno = 813 (0x32d), region = 48 }
  0x33   : > { %1693 = dma.done.wait (%p2183_p1), [#allocation3], 2048   ;;  %p2184_p0 = pmov %p2183_p1 }
  0x34   : > { %s1239_s18 = sshll.u32 %s1784_s28, 4  ;;  %v1719_v0 = vmov 0   ;;  %v320_v1 = vld [vmem:[%s2168_s1] sm:$0xff]  ;;  %vm363_vm0 = vcmask 1043456   ;;  %vm338_vm1 = vcmask 64512   ;;  %v1478_v63 = vld [vmem:[#allocation2 + $0x48] sm:$0xff]  }
  0x35   : > { %1695 = vsyncadd (%p2184_p0), [#allocation3], 4294965248  ;;  %402 = vmatprep.mubr.bf16.mxu0 %v1719_v0  ;;  %p289_p5 = scmp.lt.s32.totalorder %s1239_s18, 31  ;;  %v1242_v4 = vcombine.high %v320_v1, %v320_v1  ;;  %v1241_v5 = vcombine.low %v320_v1, %v320_v1  ;;  %v1428_v9 = vld [vmem:[%s2170_s3 + $0x4] ss:$8 sps:$4 sm:$0xff]   ;;  %v1480_v1 = vld [vmem:[#allocation2 + $0x50] sm:$0xff]  }
  0x36   : > { %v1430_v10 = vld [vmem:[%s2170_s3] ss:$8 sps:$4 sm:$0xff]   ;;  %v1431_v11 = vld [vmem:[%s2170_s3 + $0x14] ss:$8 sps:$4 sm:$0xff]   ;;  %735 = vmatprep.subr.bf16.mxu1 %v1428_v9  ;;  %v1433_v13 = vld [vmem:[%s2170_s3 + $0x10] ss:$8 sps:$4 sm:$0xff]   ;;  %v323_v9 = vlaneseq }
  0x37   : > { %s2192_s18 = smov (!%p289_p5, %s1239_s18), 31  ;;  %1243 = vmatprep.subr.msk.bf16.mxu0 %vm363_vm0, %v1242_v4  ;;  %v365_v6 = vsel %vm363_vm0, %v1241_v5, 0  ;;  %736 = vmatpush1.bf16.msra.mxu1 %v1430_v10  ;;  %v1434_v14 = vld [vmem:[%s2170_s3 + $0x24] ss:$8 sps:$4 sm:$0xff]   ;;  %v1436_v16 = vld [vmem:[%s2170_s3 + $0x20] ss:$8 sps:$4 sm:$0xff]  }
  0x38   : > { %s1240_s16 = sshll.u32 %s2192_s18, 3  ;;  %371 = vmatpush1.bf16.msra.mxu0 %v365_v6  ;;  %737 = vmatprep.subr.bf16.mxu1 %v1431_v11  ;;  %v1437_v17 = vld [vmem:[%s2170_s3 + $0x34] ss:$8 sps:$4 sm:$0xff]   ;;  %v1439_v20 = vld [vmem:[%s2170_s3 + $0x30] ss:$8 sps:$4 sm:$0xff]   ;;  %v1476_v61 = vld [vmem:[#allocation2 + $0x40] sm:$0xff]  }
  0x39   : > { %s1851_s15 = scalar_lea.vmem %s2167_s0, %s1240_s16  ;;  %v1440_v21 = vld [vmem:[%s2170_s3 + $0x44] ss:$8 sps:$4 sm:$0xff]   ;;  %v1442_v23 = vld [vmem:[%s2170_s3 + $0x40] ss:$8 sps:$4 sm:$0xff]   ;;  %v1443_v24 = vld [vmem:[%s2170_s3 + $0x54] ss:$8 sps:$4 sm:$0xff]   ;;  %1307 = vmatprep.subr.bf16.mxu0 %v1476_v61 }
  0x3a   : > { %v296_v2 = vld [vmem:[%s1851_s15] sm:$0xff]  ;;  %v297_v3 = vld [vmem:[%s1851_s15 + $0x8] sm:$0xff]  ;;  %v298_v8 = vld [vmem:[%s1851_s15 + $0x10] sm:$0xff]  ;;  %v1983_v10 = vshrl.u32 %v323_v9, 7  ;;  %s285_s23 = sand.u32 1, %s1706_s25   ;;  %s1306_s17 = sshll.u32 %s1784_s28, 11 }
  0x3b   : > { %v312_v7 = vpack.c.bf16 %v297_v3, %v296_v2  ;;  %v299_v12 = vld [vmem:[%s1851_s15 + $0x18] sm:$0xff]  ;;  %738 = vmatpush1.bf16.msra.mxu1 %v1433_v13  ;;  %v300_v18 = vld [vmem:[%s1851_s15 + $0x20] sm:$0xff]  ;;  %v301_v19 = vld [vmem:[%s1851_s15 + $0x28] sm:$0xff]  ;;  %s1238_s29 = sshll.u32 %s285_s23, 7  ;;  %s2117_s20 = scalar_lea.hbm %s2174_s7, %s1306_s17 }
  0x3c   : > { %v313_v15 = vpack.c.bf16 %v299_v12, %v298_v8  ;;  %739 = vmatprep.subr.bf16.mxu1 %v1434_v14  ;;  %v314_v22 = vpack.c.bf16 %v301_v19, %v300_v18  ;;  %v302_v25 = vld [vmem:[%s1851_s15 + $0x30] sm:$0xff]  ;;  %v303_v26 = vld [vmem:[%s1851_s15 + $0x38] sm:$0xff]  ;;  %v1446_v28 = vld [vmem:[%s2170_s3 + $0x64] ss:$8 sps:$4 sm:$0xff]   ;;  %v325_v11 = vsub.s32 0, %v1983_v10  ;;  %v329_v13 = vsub.s32 1, %v1983_v10 }
  0x3d   : > { %1244 = vmatmul.mubr.msk.bf16.vlgmr.msra.gmra.mrb[0].mxu0 %vm338_vm1, %v312_v7  ;;  %v1445_v27 = vld [vmem:[%s2170_s3 + $0x50] ss:$8 sps:$4 sm:$0xff]   ;;  %v315_v29 = vpack.c.bf16 %v303_v26, %v302_v25  ;;  %v1448_v30 = vld [vmem:[%s2170_s3 + $0x60] ss:$8 sps:$4 sm:$0xff]   ;;  %v1449_v31 = vld [vmem:[%s2170_s3 + $0x74] ss:$8 sps:$4 sm:$0xff]  }
  0x3e   : > { %412 = vmatprep.mubr.bf16.mxu0 %v1719_v0  ;;  %v304_v32 = vld [vmem:[%s1851_s15 + $0x40] sm:$0xff]  ;;  %v305_v33 = vld [vmem:[%s1851_s15 + $0x48] sm:$0xff]  ;;  %v1451_v34 = vld [vmem:[%s2170_s3 + $0x70] ss:$8 sps:$4 sm:$0xff]   ;;  %s2082_s14 = scalar_lea.vmem [#allocation5], %s1238_s29  ;;  %s2126_s28 = scalar_lea.sflag [#allocation4], %s285_s23 }
  0x3f   : > { %740 = vmatpush1.bf16.msra.mxu1 %v1436_v16  ;;  %v1452_v35 = vld [vmem:[%s2170_s3 + $0x84] ss:$8 sps:$4 sm:$0xff]   ;;  %v316_v36 = vpack.c.bf16 %v305_v33, %v304_v32  ;;  %v1454_v37 = vld [vmem:[%s2170_s3 + $0x80] ss:$8 sps:$4 sm:$0xff]   ;;  %v1455_v38 = vld [vmem:[%s2170_s3 + $0x94] ss:$8 sps:$4 sm:$0xff]  }
  0x40   : > { %741 = vmatprep.subr.bf16.mxu1 %v1437_v17  ;;  %v306_v39 = vld [vmem:[%s1851_s15 + $0x50] sm:$0xff]  ;;  %v307_v40 = vld [vmem:[%s1851_s15 + $0x58] sm:$0xff]  ;;  %v1458_v42 = vld [vmem:[%s2170_s3 + $0xa4] ss:$8 sps:$4 sm:$0xff]   ;;  %s1158_s18 = sshll.u32 %s2082_s14, 4  ;;  %p2185_p9 = scmp.ne.s32.totalorder %s2178_s11, 0  ;;  %s2119_s18 = int_to_ptr.vmem [resolvable:$true] %s1158_s18 }
  0x41   : > { %v1457_v41 = vld [vmem:[%s2170_s3 + $0x90] ss:$8 sps:$4 sm:$0xff]   ;;  %v317_v43 = vpack.c.bf16 %v307_v40, %v306_v39  ;;  %v1460_v44 = vld [vmem:[%s2170_s3 + $0xa0] ss:$8 sps:$4 sm:$0xff]   ;;  %v1461_v51 = vld [vmem:[%s2170_s3 + $0xb4] ss:$8 sps:$4 sm:$0xff]  }
  0x42   : > { %v308_v45 = vld [vmem:[%s1851_s15 + $0x60] sm:$0xff]  ;;  %v309_v46 = vld [vmem:[%s1851_s15 + $0x68] sm:$0xff]  ;;  %v310_v48 = vld [vmem:[%s1851_s15 + $0x70] sm:$0xff]  ;;  %s1648_s13 = scalar_lea.vmem %s2119_s18, 2048  ;;  %s1720_s21 = smov [#allocation5]  }
  0x43   : > { %742 = vmatpush1.bf16.msra.mxu1 %v1439_v20  ;;  %v318_v47 = vpack.c.bf16 %v309_v46, %v308_v45  ;;  %v311_v49 = vld [vmem:[%s1851_s15 + $0x78] sm:$0xff]  ;;  %v1464_v53 = vld [vmem:[%s2170_s3 + $0xc4] ss:$8 sps:$4 sm:$0xff]   ;;  %v1466_v54 = vld [vmem:[%s2170_s3 + $0xc0] ss:$8 sps:$4 sm:$0xff]   ;;  %p1649_p6 = scmp.ne.s32.totalorder %s2119_s18, %s1648_s13  ;;  %s1652_s15 = sshll.u32 %s1720_s21, 4  ;;  %s1653_s15 = int_to_ptr.vmem [resolvable:$false] %s1652_s15 }
  0x44   : > { %743 = vmatprep.subr.bf16.mxu1 %v1440_v21  ;;  %v319_v50 = vpack.c.bf16 %v311_v49, %v310_v48  ;;  %v1463_v52 = vld [vmem:[%s2170_s3 + $0xb0] ss:$8 sps:$4 sm:$0xff]   ;;  %v1467_v55 = vld [vmem:[%s2170_s3 + $0xd4] ss:$8 sps:$4 sm:$0xff]   ;;  %v1470_v57 = vld [vmem:[%s2170_s3 + $0xe4] ss:$8 sps:$4 sm:$0xff]   ;;  %p1655_p2 = scmp.lt.s32.totalorder %s2119_s18, %s1653_s15 }
  0x45   : > { %1245 = vmatmul.mubr.msk.bf16.gmra.mrb[4].mxu0 %vm338_vm1, %v313_v15  ;;  %v1469_v56 = vld [vmem:[%s2170_s3 + $0xd0] ss:$8 sps:$4 sm:$0xff]   ;;  %v1472_v58 = vld [vmem:[%s2170_s3 + $0xe0] ss:$8 sps:$4 sm:$0xff]   ;;  %v1473_v59 = vld [vmem:[%s2170_s3 + $0xf4] ss:$8 sps:$4 sm:$0xff]   ;;  %p1650_p10 = pnand %p1649_p6, %p2185_p9 }
  0x46   : > { %422 = vmatprep.mubr.bf16.mxu0 %v1719_v0  ;;  %v1475_v60 = vld [vmem:[%s2170_s3 + $0xf0] ss:$8 sps:$4 sm:$0xff]   ;;  %v1477_v62 = vld [vmem:[#allocation2] sm:$0xff]   ;;  %v1486_v7 = vld [vmem:[#allocation2 + $0x68] sm:$0xff]   ;;  %s1654_s22 = scalar_lea.vmem %s1653_s15, 4096 }
  0x47   : > { %744 = vmatpush1.bf16.msra.mxu1 %v1442_v23  ;;  %1308 = vmatpush3.bf16.msra.mxu0 %v1477_v62  ;;  %v1481_v2 = vld [vmem:[#allocation2 + $0x10] sm:$0xff]   ;;  %v1482_v3 = vld [vmem:[#allocation2 + $0x58] sm:$0xff]   ;;  %v1484_v5 = vld [vmem:[#allocation2 + $0x60] sm:$0xff]   ;;  %p1651_p12 = pneg %p1650_p10  ;;  %p1656_p3 = scmp.lt.s32.totalorder %s1654_s22, %s1648_s13 }
  0x48   : > { %745 = vmatprep.subr.bf16.mxu1 %v1443_v24  ;;  %1309 = vmatprep.subr.bf16.mxu0 %v1478_v63  ;;  %v1483_v4 = vld [vmem:[#allocation2 + $0x18] sm:$0xff]   ;;  %v1485_v6 = vld [vmem:[#allocation2 + $0x20] sm:$0xff]   ;;  %v1487_v8 = vld [vmem:[#allocation2 + $0x28] sm:$0xff]  }
  0x49   : > { %v321_v12 = vld [vmem:[%s2169_s2] sm:$0x3]  ;;  %p1657_p4 = por %p1656_p3, %p1655_p2 }
  0x4a   : > { %v1992_v14 = vrot.slane %v321_v12, %v325_v11  ;;  %v1996_v15 = vrot.slane %v321_v12, %v329_v13 }
  0x4b   : > { %746 = vmatpush1.bf16.msra.mxu1 %v1445_v27  ;;  %p1658_p7 = pnand %p1657_p4, %p1651_p12 }
  0x4c   : > { %747 = vmatprep.subr.bf16.mxu1 %v1446_v28 }
  0x4d   : > { %1246 = vmatmul.mubr.msk.bf16.gmra.mrb[8].mxu0 %vm338_vm1, %v314_v22 }
  0x4e   : > { %432 = vmatprep.mubr.bf16.mxu0 %v1719_v0 }
  0x4f   : > { %748 = vmatpush1.bf16.msra.mxu1 %v1448_v30 }
  0x50   : > { %749 = vmatprep.subr.bf16.mxu1 %v1449_v31 }
  0x53   : > { %750 = vmatpush1.bf16.msra.mxu1 %v1451_v34 }
  0x54   : > { %751 = vmatprep.subr.bf16.mxu1 %v1452_v35 }
  0x55   : > { %1247 = vmatmul.mubr.msk.bf16.gmra.mrb[12].mxu0 %vm338_vm1, %v315_v29 }
  0x56   : > { %442 = vmatprep.mubr.bf16.mxu0 %v1719_v0 }
  0x57   : > { %752 = vmatpush1.bf16.msra.mxu1 %v1454_v37 }
  0x58   : > { %753 = vmatprep.subr.bf16.mxu1 %v1455_v38 }
  0x5b   : > { %754 = vmatpush1.bf16.msra.mxu1 %v1457_v41 }
  0x5c   : > { %755 = vmatprep.subr.bf16.mxu1 %v1458_v42 }
  0x5d   : > { %1248 = vmatmul.mubr.msk.bf16.gmra.mrb[16].mxu0 %vm338_vm1, %v316_v36 }
  0x5e   : > { %452 = vmatprep.mubr.bf16.mxu0 %v1719_v0 }
  0x5f   : > { %756 = vmatpush1.bf16.msra.mxu1 %v1460_v44 }
  0x60   : > { %757 = vmatprep.subr.bf16.mxu1 %v1461_v51 }
  0x63   : > { %758 = vmatpush1.bf16.msra.mxu1 %v1463_v52 }
  0x64   : > { %759 = vmatprep.subr.bf16.mxu1 %v1464_v53 }
  0x65   : > { %1249 = vmatmul.mubr.msk.bf16.gmra.mrb[20].mxu0 %vm338_vm1, %v317_v43 }
  0x66   : > { %462 = vmatprep.mubr.bf16.mxu0 %v1719_v0 }
  0x67   : > { %760 = vmatpush1.bf16.msra.mxu1 %v1466_v54 }
  0x68   : > { %761 = vmatprep.subr.bf16.mxu1 %v1467_v55 }
  0x6b   : > { %762 = vmatpush1.bf16.msra.mxu1 %v1469_v56 }
  0x6c   : > { %763 = vmatprep.subr.bf16.mxu1 %v1470_v57 }
  0x6d   : > { %1250 = vmatmul.mubr.msk.bf16.gmra.mrb[24].mxu0 %vm338_vm1, %v318_v47 }
  0x6e   : > { %472 = vmatprep.mubr.bf16.mxu0 %v1719_v0  ;;  %v1479_v0 = vld [vmem:[#allocation2 + $0x8] sm:$0xff]  }
  0x6f   : > { %764 = vmatpush1.bf16.msra.mxu1 %v1472_v58  ;;  %1310 = vmatpush3.bf16.msra.mxu0 %v1479_v0 }
  0x70   : > { %765 = vmatprep.subr.bf16.mxu1 %v1473_v59  ;;  %1311 = vmatprep.subr.bf16.mxu0 %v1480_v1 }
  0x73   : > { %766 = vmatpush1.bf16.msra.mxu1 %v1475_v60  ;;  %1312 = vmatpush3.bf16.msra.mxu0 %v1481_v2 }
  0x74   : > { %1313 = vmatprep.subr.bf16.mxu0 %v1482_v3 }
  0x75   : > { %1251 = vmatmul.mubr.msk.bf16.gmra.mrb[28].mxu0 %vm338_vm1, %v319_v50 }
  0x77   : > { %1314 = vmatpush3.bf16.msra.mxu0 %v1483_v4 }
  0x78   : > { %1315 = vmatprep.subr.bf16.mxu0 %v1484_v5 }
  0x7b   : > { %1316 = vmatpush3.bf16.msra.mxu0 %v1485_v6 }
  0x7c   : > { %1317 = vmatprep.subr.bf16.mxu0 %v1486_v7 }
  0x7f   : > { %1318 = vmatpush3.bf16.msra.mxu0 %v1487_v8 }
 0x110   : > { %v404_v16 = vpop.f32.mrb[0].mxu0 }
 0x111   : > { %v405_v17 = vadd.f32 %v404_v16, %v1992_v14  ;;  %v406_v18 = vpop.f32.mrb[1].mxu0 }
 0x112   : > { %v407_v19 = vadd.f32 %v406_v18, %v1996_v15  ;;  %v408_v20 = vpop.f32.mrb[2].mxu0 }
 0x113   : > { %1492 = vtanh.f32 %v405_v17  ;;  %v409_v21 = vadd.f32 %v408_v20, %v1992_v14  ;;  %v410_v22 = vpop.f32.mrb[3].mxu0 }
 0x114   : > { %1494 = vtanh.f32 %v407_v19  ;;  %v411_v23 = vadd.f32 %v410_v22, %v1996_v15 }
 0x115   : > { %1496 = vtanh.f32 %v409_v21 }
 0x116   : > { %1498 = vtanh.f32 %v411_v23 }
 0x118   : > { %v414_v24 = vpop.f32.mrb[4].mxu0 }
 0x119   : > { %v415_v25 = vadd.f32 %v414_v24, %v1992_v14  ;;  %v416_v26 = vpop.f32.mrb[5].mxu0 }
 0x11a   : > { %v417_v27 = vadd.f32 %v416_v26, %v1996_v15  ;;  %v418_v28 = vpop.f32.mrb[6].mxu0 }
 0x11b   : > { %1500 = vtanh.f32 %v415_v25  ;;  %v419_v29 = vadd.f32 %v418_v28, %v1992_v14  ;;  %v420_v30 = vpop.f32.mrb[7].mxu0 }
 0x11c   : > { %1502 = vtanh.f32 %v417_v27  ;;  %v421_v31 = vadd.f32 %v420_v30, %v1996_v15 }
 0x11d   : > { %v1493_v32 = vpop.eup %1492  ;;  %1504 = vtanh.f32 %v419_v29 }
 0x11e   : > { %v1495_v33 = vpop.eup %1494  ;;  %1506 = vtanh.f32 %v421_v31 }
 0x11f   : > { %v1497_v34 = vpop.eup %1496 }
 0x120   : > { %v1499_v35 = vpop.eup %1498  ;;  %v424_v36 = vpop.f32.mrb[8].mxu0  ;;  %v515_v37 = vpack.c.bf16 %v1497_v34, %v1493_v32 }
 0x121   : > { %v425_v38 = vadd.f32 %v424_v36, %v1992_v14  ;;  %v426_v39 = vpop.f32.mrb[9].mxu0  ;;  %v516_v40 = vpack.c.bf16 %v1499_v35, %v1495_v33 }
 0x122   : > { %v427_v41 = vadd.f32 %v426_v39, %v1996_v15  ;;  %v428_v42 = vpop.f32.mrb[10].mxu0 }
 0x123   : > { %1508 = vtanh.f32 %v425_v38  ;;  %v429_v43 = vadd.f32 %v428_v42, %v1992_v14  ;;  %v430_v44 = vpop.f32.mrb[11].mxu0  ;;  %767 = vmatprep.mubr.bf16.mxu1 %v516_v40 }
 0x124   : > { %1510 = vtanh.f32 %v427_v41  ;;  %v431_v45 = vadd.f32 %v430_v44, %v1996_v15  ;;  %768 = vmatmul.mubr.bf16.vlgmr.msra.gmra.mrb[0].mxu1 %v515_v37 }
 0x125   : > { %v1501_v46 = vpop.eup %1500  ;;  %1512 = vtanh.f32 %v429_v43 }
 0x126   : > { %v1503_v47 = vpop.eup %1502  ;;  %1514 = vtanh.f32 %v431_v45 }
 0x127   : > { %v1505_v48 = vpop.eup %1504 }
 0x128   : > { %v1507_v49 = vpop.eup %1506  ;;  %v434_v50 = vpop.f32.mrb[12].mxu0  ;;  %v517_v51 = vpack.c.bf16 %v1505_v48, %v1501_v46 }
 0x129   : > { %v435_v52 = vadd.f32 %v434_v50, %v1992_v14  ;;  %v436_v53 = vpop.f32.mrb[13].mxu0  ;;  %v518_v54 = vpack.c.bf16 %v1507_v49, %v1503_v47 }
 0x12a   : > { %v437_v55 = vadd.f32 %v436_v53, %v1996_v15  ;;  %v438_v56 = vpop.f32.mrb[14].mxu0 }
 0x12b   : > { %1516 = vtanh.f32 %v435_v52  ;;  %v439_v57 = vadd.f32 %v438_v56, %v1992_v14  ;;  %v440_v58 = vpop.f32.mrb[15].mxu0  ;;  %777 = vmatprep.mubr.bf16.mxu1 %v518_v54 }
 0x12c   : > { %1518 = vtanh.f32 %v437_v55  ;;  %v441_v59 = vadd.f32 %v440_v58, %v1996_v15  ;;  %778 = vmatmul.mubr.bf16.gmra.mrb[4].mxu1 %v517_v51 }
 0x12d   : > { %v1509_v60 = vpop.eup %1508  ;;  %1520 = vtanh.f32 %v439_v57 }
 0x12e   : > { %v1511_v61 = vpop.eup %1510  ;;  %1522 = vtanh.f32 %v441_v59 }
 0x12f   : > { %v1513_v62 = vpop.eup %1512 }
 0x130   : > { %v1515_v63 = vpop.eup %1514  ;;  %v444_v0 = vpop.f32.mrb[16].mxu0  ;;  %v519_v1 = vpack.c.bf16 %v1513_v62, %v1509_v60 }
 0x131   : > { %v445_v2 = vadd.f32 %v444_v0, %v1992_v14  ;;  %v446_v3 = vpop.f32.mrb[17].mxu0  ;;  %v520_v4 = vpack.c.bf16 %v1515_v63, %v1511_v61 }
 0x132   : > { %v447_v5 = vadd.f32 %v446_v3, %v1996_v15  ;;  %v448_v6 = vpop.f32.mrb[18].mxu0 }
 0x133   : > { %1524 = vtanh.f32 %v445_v2  ;;  %v449_v7 = vadd.f32 %v448_v6, %v1992_v14  ;;  %v450_v8 = vpop.f32.mrb[19].mxu0  ;;  %787 = vmatprep.mubr.bf16.mxu1 %v520_v4  ;;  %v1489_v4 = vld [vmem:[#allocation2 + $0x30] sm:$0xff]   ;;  %v1491_v6 = vld [vmem:[#allocation2 + $0x38] sm:$0xff]  }
 0x134   : > { %1526 = vtanh.f32 %v447_v5  ;;  %v451_v9 = vadd.f32 %v450_v8, %v1996_v15  ;;  %788 = vmatmul.mubr.bf16.gmra.mrb[8].mxu1 %v519_v1  ;;  %v1490_v5 = vld [vmem:[#allocation2 + $0x78] sm:$0xff]  }
 0x135   : > { %v1517_v12 = vpop.eup %1516  ;;  %1528 = vtanh.f32 %v449_v7  ;;  %v563_v7 = vld [vmem:[%s2171_s4] sm:$0x3] }
 0x136   : > { %v1519_v16 = vpop.eup %1518  ;;  %1530 = vtanh.f32 %v451_v9  ;;  %v2035_v8 = vrot.slane %v563_v7, %v325_v11  ;;  %v2039_v9 = vrot.slane %v563_v7, %v329_v13 }
 0x137   : > { %v1521_v17 = vpop.eup %1520 }
 0x138   : > { %v1523_v18 = vpop.eup %1522  ;;  %v454_v19 = vpop.f32.mrb[20].mxu0  ;;  %v521_v20 = vpack.c.bf16 %v1521_v17, %v1517_v12 }
 0x139   : > { %v455_v21 = vadd.f32 %v454_v19, %v1992_v14  ;;  %v456_v22 = vpop.f32.mrb[21].mxu0  ;;  %v522_v23 = vpack.c.bf16 %v1523_v18, %v1519_v16 }
 0x13a   : > { %v457_v24 = vadd.f32 %v456_v22, %v1996_v15  ;;  %v458_v25 = vpop.f32.mrb[22].mxu0 }
 0x13b   : > { %1532 = vtanh.f32 %v455_v21  ;;  %v459_v26 = vadd.f32 %v458_v25, %v1992_v14  ;;  %v460_v27 = vpop.f32.mrb[23].mxu0  ;;  %797 = vmatprep.mubr.bf16.mxu1 %v522_v23 }
 0x13c   : > { %1534 = vtanh.f32 %v457_v24  ;;  %v461_v28 = vadd.f32 %v460_v27, %v1996_v15  ;;  %798 = vmatmul.mubr.bf16.gmra.mrb[12].mxu1 %v521_v20 }
 0x13d   : > { %v1525_v29 = vpop.eup %1524  ;;  %1536 = vtanh.f32 %v459_v26 }
 0x13e   : > { %v1527_v30 = vpop.eup %1526  ;;  %1538 = vtanh.f32 %v461_v28 }
 0x13f   : > { %v1529_v31 = vpop.eup %1528 }
 0x140   : > { %v1531_v32 = vpop.eup %1530  ;;  %v464_v33 = vpop.f32.mrb[24].mxu0  ;;  %v523_v34 = vpack.c.bf16 %v1529_v31, %v1525_v29 }
 0x141   : > { %v465_v35 = vadd.f32 %v464_v33, %v1992_v14  ;;  %v466_v36 = vpop.f32.mrb[25].mxu0  ;;  %v524_v37 = vpack.c.bf16 %v1531_v32, %v1527_v30 }
 0x142   : > { %v467_v38 = vadd.f32 %v466_v36, %v1996_v15  ;;  %v468_v39 = vpop.f32.mrb[26].mxu0 }
 0x143   : > { %1540 = vtanh.f32 %v465_v35  ;;  %v469_v40 = vadd.f32 %v468_v39, %v1992_v14  ;;  %v470_v41 = vpop.f32.mrb[27].mxu0  ;;  %807 = vmatprep.mubr.bf16.mxu1 %v524_v37 }
 0x144   : > { %1542 = vtanh.f32 %v467_v38  ;;  %v471_v42 = vadd.f32 %v470_v41, %v1996_v15  ;;  %808 = vmatmul.mubr.bf16.gmra.mrb[16].mxu1 %v523_v34 }
 0x145   : > { %v1533_v43 = vpop.eup %1532  ;;  %1544 = vtanh.f32 %v469_v40 }
 0x146   : > { %v1535_v44 = vpop.eup %1534  ;;  %1546 = vtanh.f32 %v471_v42 }
 0x147   : > { %v1537_v45 = vpop.eup %1536 }
 0x148   : > { %v1539_v46 = vpop.eup %1538  ;;  %v474_v47 = vpop.f32.mrb[28].mxu0  ;;  %v525_v48 = vpack.c.bf16 %v1537_v45, %v1533_v43 }
 0x149   : > { %v475_v49 = vadd.f32 %v474_v47, %v1992_v14  ;;  %v476_v50 = vpop.f32.mrb[29].mxu0  ;;  %v526_v51 = vpack.c.bf16 %v1539_v46, %v1535_v44 }
 0x14a   : > { %v477_v52 = vadd.f32 %v476_v50, %v1996_v15  ;;  %v478_v53 = vpop.f32.mrb[30].mxu0 }
 0x14b   : > { %1548 = vtanh.f32 %v475_v49  ;;  %v479_v54 = vadd.f32 %v478_v53, %v1992_v14  ;;  %v480_v55 = vpop.f32.mrb[31].mxu0  ;;  %817 = vmatprep.mubr.bf16.mxu1 %v526_v51 }
 0x14c   : > { %1550 = vtanh.f32 %v477_v52  ;;  %v481_v56 = vadd.f32 %v480_v55, %v1996_v15  ;;  %818 = vmatmul.mubr.bf16.gmra.mrb[20].mxu1 %v525_v48  ;;  %v1488_v15 = vld [vmem:[#allocation2 + $0x70] sm:$0xff]  }
 0x14d   : > { %v1541_v57 = vpop.eup %1540  ;;  %1552 = vtanh.f32 %v479_v54  ;;  %1319 = vmatprep.subr.bf16.mxu0 %v1488_v15 }
 0x14e   : > { %v1543_v58 = vpop.eup %1542  ;;  %1554 = vtanh.f32 %v481_v56  ;;  %1320 = vmatpush3.bf16.msra.mxu0 %v1489_v4 }
 0x14f   : > { %v1545_v59 = vpop.eup %1544  ;;  %1321 = vmatprep.subr.bf16.mxu0 %v1490_v5 }
 0x150   : > { %v1547_v60 = vpop.eup %1546  ;;  %v527_v61 = vpack.c.bf16 %v1545_v59, %v1541_v57 }
 0x151   : > { %v528_v62 = vpack.c.bf16 %v1547_v60, %v1543_v58 }
 0x152   : > { %1322 = vmatpush3.bf16.msra.mxu0 %v1491_v6 }
 0x153   : > { %827 = vmatprep.mubr.bf16.mxu1 %v528_v62 }
 0x154   : > { %828 = vmatmul.mubr.bf16.gmra.mrb[24].mxu1 %v527_v61 }
 0x155   : > { %v1549_v63 = vpop.eup %1548 }
 0x156   : > { %v1551_v0 = vpop.eup %1550 }
 0x157   : > { %v1553_v1 = vpop.eup %1552 }
 0x158   : > { %v1555_v14 = vpop.eup %1554  ;;  %v529_v2 = vpack.c.bf16 %v1553_v1, %v1549_v63 }
 0x159   : > { %v530_v3 = vpack.c.bf16 %v1555_v14, %v1551_v0 }
 0x15b   : > { %837 = vmatprep.mubr.bf16.mxu1 %v530_v3 }
 0x15c   : > { %838 = vmatmul.mubr.bf16.gmra.mrb[28].mxu1 %v529_v2 }
 0x1f7   : > { %v769_v12 = vpop.f32.mrb[0].mxu1 }
 0x1f8   : > { %v770_v16 = vadd.f32 %v769_v12, %v2035_v8  ;;  %v771_v17 = vpop.f32.mrb[1].mxu1 }
 0x1f9   : > { %v772_v18 = vadd.f32 %v771_v17, %v2039_v9  ;;  %v773_v19 = vpop.f32.mrb[2].mxu1 }
 0x1fa   : > { %1556 = vtanh.f32 %v770_v16  ;;  %v774_v20 = vadd.f32 %v773_v19, %v2035_v8  ;;  %v775_v21 = vpop.f32.mrb[3].mxu1 }
 0x1fb   : > { %1558 = vtanh.f32 %v772_v18  ;;  %v776_v22 = vadd.f32 %v775_v21, %v2039_v9 }
 0x1fc   : > { %1560 = vtanh.f32 %v774_v20 }
 0x1fd   : > { %1562 = vtanh.f32 %v776_v22 }
 0x1ff   : > { %v779_v11 = vpop.f32.mrb[4].mxu1 }
 0x200   : > { %v780_v10 = vadd.f32 %v779_v11, %v2035_v8  ;;  %v781_v13 = vpop.f32.mrb[5].mxu1 }
 0x201   : > { %v782_v23 = vadd.f32 %v781_v13, %v2039_v9  ;;  %v783_v24 = vpop.f32.mrb[6].mxu1 }
 0x202   : > { %1564 = vtanh.f32 %v780_v10  ;;  %v784_v25 = vadd.f32 %v783_v24, %v2035_v8  ;;  %v785_v26 = vpop.f32.mrb[7].mxu1 }
 0x203   : > { %1566 = vtanh.f32 %v782_v23  ;;  %v786_v27 = vadd.f32 %v785_v26, %v2039_v9 }
 0x204   : > { %v1557_v28 = vpop.eup %1556  ;;  %1568 = vtanh.f32 %v784_v25 }
 0x205   : > { %v1559_v29 = vpop.eup %1558  ;;  %1570 = vtanh.f32 %v786_v27 }
 0x206   : > { %v1561_v30 = vpop.eup %1560 }
 0x207   : > { %v1563_v31 = vpop.eup %1562  ;;  %v789_v32 = vpop.f32.mrb[8].mxu1  ;;  %v880_v33 = vpack.c.bf16 %v1561_v30, %v1557_v28 }
 0x208   : > { %v790_v34 = vadd.f32 %v789_v32, %v2035_v8  ;;  %v791_v35 = vpop.f32.mrb[9].mxu1  ;;  %v881_v36 = vpack.c.bf16 %v1563_v31, %v1559_v29 }
 0x209   : > { %v792_v37 = vadd.f32 %v791_v35, %v2039_v9  ;;  %v793_v38 = vpop.f32.mrb[10].mxu1 }
 0x20a   : > { %1572 = vtanh.f32 %v790_v34  ;;  %v794_v39 = vadd.f32 %v793_v38, %v2035_v8  ;;  %v795_v40 = vpop.f32.mrb[11].mxu1  ;;  %1063 = vmatprep.mubr.bf16.mxu0 %v881_v36 }
 0x20b   : > { %1574 = vtanh.f32 %v792_v37  ;;  %v796_v41 = vadd.f32 %v795_v40, %v2039_v9  ;;  %1064 = vmatmul.mubr.bf16.vlgmr.msra.gmra.mrb[32].mxu0 %v880_v33 }
 0x20c   : > { %v1565_v42 = vpop.eup %1564  ;;  %1576 = vtanh.f32 %v794_v39 }
 0x20d   : > { %v1567_v43 = vpop.eup %1566  ;;  %1578 = vtanh.f32 %v796_v41 }
 0x20e   : > { %v1569_v44 = vpop.eup %1568 }
 0x20f   : > { %v1571_v45 = vpop.eup %1570  ;;  %v799_v46 = vpop.f32.mrb[12].mxu1  ;;  %v882_v47 = vpack.c.bf16 %v1569_v44, %v1565_v42 }
 0x210   : > { %v800_v48 = vadd.f32 %v799_v46, %v2035_v8  ;;  %v801_v49 = vpop.f32.mrb[13].mxu1  ;;  %v883_v50 = vpack.c.bf16 %v1571_v45, %v1567_v43 }
 0x211   : > { %v802_v51 = vadd.f32 %v801_v49, %v2039_v9  ;;  %v803_v52 = vpop.f32.mrb[14].mxu1 }
 0x212   : > { %1580 = vtanh.f32 %v800_v48  ;;  %v804_v53 = vadd.f32 %v803_v52, %v2035_v8  ;;  %v805_v54 = vpop.f32.mrb[15].mxu1  ;;  %1071 = vmatprep.mubr.bf16.mxu0 %v883_v50 }
 0x213   : > { %1582 = vtanh.f32 %v802_v51  ;;  %v806_v55 = vadd.f32 %v805_v54, %v2039_v9  ;;  %1072 = vmatmul.mubr.bf16.gmra.mrb[36].mxu0 %v882_v47 }
 0x214   : > { %v1573_v56 = vpop.eup %1572  ;;  %1584 = vtanh.f32 %v804_v53 }
 0x215   : > { %v1575_v57 = vpop.eup %1574  ;;  %1586 = vtanh.f32 %v806_v55 }
 0x216   : > { %v1577_v58 = vpop.eup %1576 }
 0x217   : > { %v1579_v59 = vpop.eup %1578  ;;  %v809_v60 = vpop.f32.mrb[16].mxu1  ;;  %v884_v61 = vpack.c.bf16 %v1577_v58, %v1573_v56 }
 0x218   : > { %v810_v62 = vadd.f32 %v809_v60, %v2035_v8  ;;  %v811_v63 = vpop.f32.mrb[17].mxu1  ;;  %v885_v0 = vpack.c.bf16 %v1579_v59, %v1575_v57 }
 0x219   : > { %v812_v1 = vadd.f32 %v811_v63, %v2039_v9  ;;  %v813_v14 = vpop.f32.mrb[18].mxu1 }
 0x21a   : > { %1588 = vtanh.f32 %v810_v62  ;;  %v814_v2 = vadd.f32 %v813_v14, %v2035_v8  ;;  %v815_v3 = vpop.f32.mrb[19].mxu1  ;;  %1079 = vmatprep.mubr.bf16.mxu0 %v885_v0 }
 0x21b   : > { %1590 = vtanh.f32 %v812_v1  ;;  %v816_v15 = vadd.f32 %v815_v3, %v2039_v9  ;;  %1080 = vmatmul.mubr.bf16.gmra.mrb[40].mxu0 %v884_v61  ;;  %v2079_v61 = vld [vmem:[%s2173_s6] ss:$0 sm:$0xff] }
 0x21c   : > { %v1581_v4 = vpop.eup %1580  ;;  %1592 = vtanh.f32 %v814_v2 }
 0x21d   : > { %v1583_v5 = vpop.eup %1582  ;;  %1594 = vtanh.f32 %v816_v15 }
 0x21e   : > { %v1585_v6 = vpop.eup %1584 }
 0x21f   : > { %v1587_v7 = vpop.eup %1586  ;;  %v819_v12 = vpop.f32.mrb[20].mxu1  ;;  %v886_v16 = vpack.c.bf16 %v1585_v6, %v1581_v4 }
 0x220   : > { %v820_v17 = vadd.f32 %v819_v12, %v2035_v8  ;;  %v821_v18 = vpop.f32.mrb[21].mxu1  ;;  %v887_v19 = vpack.c.bf16 %v1587_v7, %v1583_v5 }
 0x221   : > { %v822_v20 = vadd.f32 %v821_v18, %v2039_v9  ;;  %v823_v21 = vpop.f32.mrb[22].mxu1 }
 0x222   : > { %1596 = vtanh.f32 %v820_v17  ;;  %v824_v22 = vadd.f32 %v823_v21, %v2035_v8  ;;  %v825_v11 = vpop.f32.mrb[23].mxu1  ;;  %1087 = vmatprep.mubr.bf16.mxu0 %v887_v19 }
 0x223   : > { %1598 = vtanh.f32 %v822_v20  ;;  %v826_v10 = vadd.f32 %v825_v11, %v2039_v9  ;;  %1088 = vmatmul.mubr.bf16.gmra.mrb[44].mxu0 %v886_v16 }
 0x224   : > { %v1589_v13 = vpop.eup %1588  ;;  %1600 = vtanh.f32 %v824_v22 }
 0x225   : > { %v1591_v23 = vpop.eup %1590  ;;  %1602 = vtanh.f32 %v826_v10 }
 0x226   : > { %v1593_v24 = vpop.eup %1592 }
 0x227   : > { %v1595_v25 = vpop.eup %1594  ;;  %v829_v26 = vpop.f32.mrb[24].mxu1  ;;  %v888_v27 = vpack.c.bf16 %v1593_v24, %v1589_v13 }
 0x228   : > { %v830_v28 = vadd.f32 %v829_v26, %v2035_v8  ;;  %v831_v29 = vpop.f32.mrb[25].mxu1  ;;  %v889_v30 = vpack.c.bf16 %v1595_v25, %v1591_v23 }
 0x229   : > { %v832_v31 = vadd.f32 %v831_v29, %v2039_v9  ;;  %v833_v32 = vpop.f32.mrb[26].mxu1 }
 0x22a   : > { %1604 = vtanh.f32 %v830_v28  ;;  %v834_v33 = vadd.f32 %v833_v32, %v2035_v8  ;;  %v835_v34 = vpop.f32.mrb[27].mxu1  ;;  %1095 = vmatprep.mubr.bf16.mxu0 %v889_v30 }
 0x22b   : > { %1606 = vtanh.f32 %v832_v31  ;;  %v836_v35 = vadd.f32 %v835_v34, %v2039_v9  ;;  %1096 = vmatmul.mubr.bf16.gmra.mrb[48].mxu0 %v888_v27 }
 0x22c   : > { %v1597_v36 = vpop.eup %1596  ;;  %1608 = vtanh.f32 %v834_v33 }
 0x22d   : > { %v1599_v37 = vpop.eup %1598  ;;  %1610 = vtanh.f32 %v836_v35 }
 0x22e   : > { %v1601_v38 = vpop.eup %1600 }
 0x22f   : > { %v1603_v39 = vpop.eup %1602  ;;  %v839_v40 = vpop.f32.mrb[28].mxu1  ;;  %v890_v41 = vpack.c.bf16 %v1601_v38, %v1597_v36 }
 0x230   : > { %v840_v42 = vadd.f32 %v839_v40, %v2035_v8  ;;  %v841_v43 = vpop.f32.mrb[29].mxu1  ;;  %v891_v44 = vpack.c.bf16 %v1603_v39, %v1599_v37 }
 0x231   : > { %v842_v45 = vadd.f32 %v841_v43, %v2039_v9  ;;  %v843_v46 = vpop.f32.mrb[30].mxu1 }
 0x232   : > { %1612 = vtanh.f32 %v840_v42  ;;  %v844_v47 = vadd.f32 %v843_v46, %v2035_v8  ;;  %v845_v48 = vpop.f32.mrb[31].mxu1  ;;  %1103 = vmatprep.mubr.bf16.mxu0 %v891_v44 }
 0x233   : > { %1614 = vtanh.f32 %v842_v45  ;;  %v846_v49 = vadd.f32 %v845_v48, %v2039_v9  ;;  %1104 = vmatmul.mubr.bf16.gmra.mrb[52].mxu0 %v890_v41 }
 0x234   : > { %v1605_v50 = vpop.eup %1604  ;;  %1616 = vtanh.f32 %v844_v47 }
 0x235   : > { %v1607_v51 = vpop.eup %1606  ;;  %1618 = vtanh.f32 %v846_v49 }
 0x236   : > { %v1609_v52 = vpop.eup %1608 }
 0x237   : > { %v1611_v53 = vpop.eup %1610  ;;  %v892_v54 = vpack.c.bf16 %v1609_v52, %v1605_v50 }
 0x238   : > { %v893_v55 = vpack.c.bf16 %v1611_v53, %v1607_v51 }
 0x23a   : > { %1111 = vmatprep.mubr.bf16.mxu0 %v893_v55 }
 0x23b   : > { %1112 = vmatmul.mubr.bf16.gmra.mrb[56].mxu0 %v892_v54 }
 0x23c   : > { %v1613_v56 = vpop.eup %1612 }
 0x23d   : > { %v1615_v8 = vpop.eup %1614 }
 0x23e   : > { %v1617_v57 = vpop.eup %1616 }
 0x23f   : > { %v1619_v58 = vpop.eup %1618  ;;  %v894_v59 = vpack.c.bf16 %v1617_v57, %v1613_v56 }
 0x240   : > { %v895_v60 = vpack.c.bf16 %v1619_v58, %v1615_v8 }
 0x242   : > { %1119 = vmatprep.mubr.bf16.mxu0 %v895_v60 }
 0x243   : > { %1120 = vmatmul.mubr.bf16.gmra.mrb[60].mxu0 %v894_v59 }
 0x2de   : > { %v1323_v9 = vpop.f32.mrb[32].mxu0 }
 0x2df   : > { %v1324_v62 = vpop.f32.mrb[33].mxu0 }
 0x2e0   : > { %v1325_v63 = vadd.f32 %v1324_v62, %v1323_v9  ;;  %v1326_v0 = vpop.f32.mrb[34].mxu0 }
 0x2e1   : > { %v1327_v1 = vpop.f32.mrb[35].mxu0 }
 0x2e2   : > { %v1066_v14 = vadd.f32 %v1325_v63, %v2079_v61  ;;  %v1328_v2 = vadd.f32 %v1327_v1, %v1326_v0 }
 0x2e4   : > { %1128 = vst [vmem:[%s2082_s14] sm:$0xff] %v1066_v14  ;;  %v1069_v3 = vadd.f32 %v1328_v2, %v2079_v61 }
 0x2e6   : > { %1129 = vst [vmem:[%s2082_s14 + $0x8] sm:$0xff] %v1069_v3  ;;  %v1329_v15 = vpop.f32.mrb[36].mxu0 }
 0x2e7   : > { %v1330_v4 = vpop.f32.mrb[37].mxu0 }
 0x2e8   : > { %v1331_v5 = vadd.f32 %v1330_v4, %v1329_v15  ;;  %v1332_v6 = vpop.f32.mrb[38].mxu0 }
 0x2e9   : > { %v1333_v7 = vpop.f32.mrb[39].mxu0 }
 0x2ea   : > { %v1074_v12 = vadd.f32 %v1331_v5, %v2079_v61  ;;  %v1334_v16 = vadd.f32 %v1333_v7, %v1332_v6 }
 0x2ec   : > { %1130 = vst [vmem:[%s2082_s14 + $0x10] sm:$0xff] %v1074_v12  ;;  %v1077_v17 = vadd.f32 %v1334_v16, %v2079_v61 }
 0x2ee   : > { %1131 = vst [vmem:[%s2082_s14 + $0x18] sm:$0xff] %v1077_v17  ;;  %v1335_v18 = vpop.f32.mrb[40].mxu0 }
 0x2ef   : > { %v1336_v19 = vpop.f32.mrb[41].mxu0 }
 0x2f0   : > { %v1337_v20 = vadd.f32 %v1336_v19, %v1335_v18  ;;  %v1338_v21 = vpop.f32.mrb[42].mxu0 }
 0x2f1   : > { %v1339_v22 = vpop.f32.mrb[43].mxu0 }
 0x2f2   : > { %v1082_v11 = vadd.f32 %v1337_v20, %v2079_v61  ;;  %v1340_v10 = vadd.f32 %v1339_v22, %v1338_v21 }
 0x2f4   : > { %1132 = vst [vmem:[%s2082_s14 + $0x20] sm:$0xff] %v1082_v11  ;;  %v1085_v13 = vadd.f32 %v1340_v10, %v2079_v61 }
 0x2f6   : > { %1133 = vst [vmem:[%s2082_s14 + $0x28] sm:$0xff] %v1085_v13  ;;  %v1341_v23 = vpop.f32.mrb[44].mxu0 }
 0x2f7   : > { %v1342_v24 = vpop.f32.mrb[45].mxu0 }
 0x2f8   : > { %v1343_v25 = vadd.f32 %v1342_v24, %v1341_v23  ;;  %v1344_v26 = vpop.f32.mrb[46].mxu0 }
 0x2f9   : > { %v1345_v27 = vpop.f32.mrb[47].mxu0 }
 0x2fa   : > { %v1090_v28 = vadd.f32 %v1343_v25, %v2079_v61  ;;  %v1346_v29 = vadd.f32 %v1345_v27, %v1344_v26 }
 0x2fc   : > { %1134 = vst [vmem:[%s2082_s14 + $0x30] sm:$0xff] %v1090_v28  ;;  %v1093_v30 = vadd.f32 %v1346_v29, %v2079_v61 }
 0x2fe   : > { %1135 = vst [vmem:[%s2082_s14 + $0x38] sm:$0xff] %v1093_v30  ;;  %v1347_v31 = vpop.f32.mrb[48].mxu0 }
 0x2ff   : > { %v1348_v32 = vpop.f32.mrb[49].mxu0 }
 0x300   : > { %v1349_v33 = vadd.f32 %v1348_v32, %v1347_v31  ;;  %v1350_v34 = vpop.f32.mrb[50].mxu0 }
 0x301   : > { %v1351_v35 = vpop.f32.mrb[51].mxu0 }
 0x302   : > { %v1098_v36 = vadd.f32 %v1349_v33, %v2079_v61  ;;  %v1352_v37 = vadd.f32 %v1351_v35, %v1350_v34 }
 0x304   : > { %1136 = vst [vmem:[%s2082_s14 + $0x40] sm:$0xff] %v1098_v36  ;;  %v1101_v38 = vadd.f32 %v1352_v37, %v2079_v61 }
 0x306   : > { %1137 = vst [vmem:[%s2082_s14 + $0x48] sm:$0xff] %v1101_v38  ;;  %v1353_v39 = vpop.f32.mrb[52].mxu0 }
 0x307   : > { %v1354_v40 = vpop.f32.mrb[53].mxu0 }
 0x308   : > { %v1355_v41 = vadd.f32 %v1354_v40, %v1353_v39  ;;  %v1356_v42 = vpop.f32.mrb[54].mxu0 }
 0x309   : > { %v1357_v43 = vpop.f32.mrb[55].mxu0 }
 0x30a   : > { %v1106_v44 = vadd.f32 %v1355_v41, %v2079_v61  ;;  %v1358_v45 = vadd.f32 %v1357_v43, %v1356_v42 }
 0x30c   : > { %1138 = vst [vmem:[%s2082_s14 + $0x50] sm:$0xff] %v1106_v44  ;;  %v1109_v46 = vadd.f32 %v1358_v45, %v2079_v61 }
 0x30e   : > { %1139 = vst [vmem:[%s2082_s14 + $0x58] sm:$0xff] %v1109_v46  ;;  %v1359_v47 = vpop.f32.mrb[56].mxu0 }
 0x30f   : > { %v1360_v48 = vpop.f32.mrb[57].mxu0 }
 0x310   : > { %v1361_v49 = vadd.f32 %v1360_v48, %v1359_v47  ;;  %v1362_v50 = vpop.f32.mrb[58].mxu0 }
 0x311   : > { %v1363_v51 = vpop.f32.mrb[59].mxu0 }
 0x312   : > { %v1114_v52 = vadd.f32 %v1361_v49, %v2079_v61  ;;  %v1364_v53 = vadd.f32 %v1363_v51, %v1362_v50 }
 0x314   : > { %1140 = vst [vmem:[%s2082_s14 + $0x60] sm:$0xff] %v1114_v52  ;;  %v1117_v54 = vadd.f32 %v1364_v53, %v2079_v61 }
 0x316   : > { %1141 = vst [vmem:[%s2082_s14 + $0x68] sm:$0xff] %v1117_v54  ;;  %v1365_v55 = vpop.f32.mrb[60].mxu0 }
 0x317   : > { %v1366_v56 = vpop.f32.mrb[61].mxu0 }
 0x318   : > { %v1367_v8 = vadd.f32 %v1366_v56, %v1365_v55  ;;  %v1368_v57 = vpop.f32.mrb[62].mxu0 }
 0x319   : > { %v1369_v58 = vpop.f32.mrb[63].mxu0 }
 0x31a   : > { %v1122_v59 = vadd.f32 %v1367_v8, %v2079_v61  ;;  %v1370_v60 = vadd.f32 %v1369_v58, %v1368_v57 }
 0x31c   : > { %1142 = vst [vmem:[%s2082_s14 + $0x70] sm:$0xff] %v1122_v59  ;;  %v1125_v9 = vadd.f32 %v1370_v60, %v2079_v61 }
 0x31e   : > { %1143 = vst [vmem:[%s2082_s14 + $0x78] sm:$0xff] %v1125_v9 }
 0x31f   : > { %1661 = shalt.err (!%p1658_p7)
}
 0x320   : > { %s1662_s23 = scalar_lea.hbm %s2117_s20, 2048  ;;  %s1666_s9 = scalar_lea.hbm %s2174_s7, 4096 }
 0x321   : > { %p1663_p8 = scmp.ne.s32.totalorder %s2117_s20, %s1662_s23  ;;  %p1667_p1 = scmp.lt.u32.totalorder %s2117_s20, %s2174_s7 }
 0x322   : > { %p1668_p0 = scmp.lt.u32.totalorder %s1666_s9, %s1662_s23  ;;  %p1670_p6 = scmp.lt.u32.totalorder %s1662_s23, %s2117_s20 }
 0x323   : > { %p1664_p11 = pnand %p1663_p8, %p2185_p9 }
 0x324   : > { %p1669_p5 = por %p1668_p0, %p1667_p1 }
 0x325   : > { %p1665_p13 = pneg %p1664_p11 }
 0x326   : > { %p1671_p10 = por %p1670_p6, %p1669_p5 }
 0x328   : > { %p1672_p12 = pnand %p1671_p10, %p1665_p13 }
 0x32a   : > { %1675 = shalt.err (!%p1672_p12)
}
 0x32b   : > { %s1721_s16 = smov 128   ;;  %s1722_s19 = smov 8  }
 0x32c   : > { %1375 = dma.vmem_to_hbm [thread:$0]  (%p2185_p9), %s2119_s18, 2048, %s2117_s20, %s2126_s28, %s1721_s16, %s1721_s16, %s1722_s19  }
 0x32d PF: > { %p1387_p2 = scmp.ge.s32.totalorder %s1714_s27, 2  ;;  %s1173_s13 = sand.u32 1, %s1702_s24  }
 0x32e   : > { %p2186_p3 = scmp.ne.s32.totalorder %s2179_s12, 0  ;;  %s1174_s21 = scalar_lea.sflag [#allocation4], %s1173_s13 }
 0x330   : > { %p1382_p4 = pnand %p1387_p2, %p2186_p3 }
 0x332   : > { %1697 = dma.done.wait (!%p1382_p4), %s1174_s21, 2048  }
 0x333   : > { %1699 = vsyncadd (!%p1382_p4), %s1174_s21, 4294965248  ;;  %p18_p7 = scmp.ge.s32.totalorder %s1788_s30, 4   ;;  %s2187_s24 = smov %s1706_s25 }
 0x334   : > { %s2188_s25 = smov %s1710_s26  ;;  %s2189_s26 = smov %s1799_s10 }
 0x335   : > { %s2190_s27 = smov %s1788_s30  ;;  %20 = sbr.rel (!%p18_p7) target bundleno = 4 (0x4), region = 88 }
 0x33c   :  { %1179 = vsyncpa [#allocation3], 1 }
 0x33d   :  { %1181 = vsyncpa [#allocation3 + $0x1], 1 }
 0x33e   :  { %1182 = vsyncpa [#allocation4], 1 }
 0x33f   :  { %1184 = vsyncpa [#allocation4 + $0x1], 1 }

</bundles_post_ra>
